<compile_context>
chip_gen: v5e
topology: v5e:2x2
jax: 0.10.0
libtpu: 0.0.40
codegen_flags: <defaults>
</compile_context>

<pallas_src>
import functools

import numpy as np
import jax
import jax.numpy as jnp
from jax.experimental import pallas as pl
from jax.experimental.pallas import tpu as pltpu


def _gcn_channel_kernel(B, n, C,
                        patches_ref, w_in_ref, b_in_ref, dx_ref, dy_ref,
                        w1_ref, w2_ref, w3_ref, b_up_ref,
                        o_ref, hbuf):
    f32 = jnp.float32

    w_in = w_in_ref[...]      # (9C, C)  folded conv+BN weight (im2col layout)
    b_in = b_in_ref[...]      # (1, C)   folded conv+BN bias
    dx = dx_ref[...]          # (C, C)   sobel-x channel-axis band matrix [-1,0,1]
    dy = dy_ref[...]          # (C, C)   sobel-y channel-axis band matrix [ 1,2,1]
    w1t = w1_ref[...]         # (C, C)   fc weights already transposed to (in, out)
    w2t = w2_ref[...]
    w3t = w3_ref[...]
    b_up = b_up_ref[...]      # (H*W, n) bilinear (align_corners=True) matrix

    # n x n identity, built once per invocation (grid-invariant).
    rows = jax.lax.broadcasted_iota(jnp.int32, (n, n), 0)
    cols = jax.lax.broadcasted_iota(jnp.int32, (n, n), 1)
    eye = (rows == cols).astype(f32)

    # Zero the row-padded Sobel scratch once; the zero ring is reused for every
    # batch element (only the interior is overwritten below).
    hbuf[...] = jnp.zeros_like(hbuf)

    feats = []    # per-batch (n, C) node features  ( == self.pre(x) )
    scores = []   # per-batch (n, n) pre-softmax sobel affinity
    for bi in range(B):
        # --- input conv (3x3, stride 2, pad 1) + folded BN + ReLU: one matmul ---
        h = jnp.dot(patches_ref[bi], w_in, preferred_element_type=f32) + b_in
        h = jnp.maximum(h, 0.0)                                    # (n, C)
        feats.append(h)

        # --- Sobel on the (n, C) pseudo-image (1 channel, 3x3, pad 1) ---
        # row (n) direction: zero-padded scratch + static slices (no roll/where);
        # column (C) direction: banded matmul (the 3x3 kernels are separable).
        hbuf[1:n + 1, :] = h
        r0 = hbuf[0:n, :]
        r1 = hbuf[1:n + 1, :]
        r2 = hbuf[2:n + 2, :]
        gx = jnp.abs(jnp.dot(r0 + 2.0 * r1 + r2, dx, preferred_element_type=f32))
        gy = jnp.abs(jnp.dot(r2 - r0, dy, preferred_element_type=f32))
        # S = |Gx| @ |Gy|^T  (contract the channel axis)
        s = jax.lax.dot_general(gx, gy, (((1,), (1,)), ((), ())),
                                preferred_element_type=f32)        # (n, n)
        scores.append(s)

    # --- softmax: nn.Softmax() (implicit dim) on a 3-D tensor -> dim 0 (batch) ---
    m = scores[0]
    for s in scores[1:]:
        m = jnp.maximum(m, s)
    exps = [jnp.exp(s - m) for s in scores]
    den = exps[0]
    for e in exps[1:]:
        den = den + e
    inv_den = 1.0 / den

    for bi in range(B):
        a_soft = exps[bi] * inv_den

        # --- normalize(): D^-1/2 (A + I) D^-1/2 ---
        a1 = a_soft + eye
        d = jnp.sum(a1, axis=1, keepdims=True)        # (n, 1) row sums
        dr = jax.lax.rsqrt(d)
        # Row scale with the (n,1) vector; column scale via a diagonal-matrix
        # matmul (eye * dr == diag(dr)), avoiding an in-kernel transpose of dr.
        a_norm = jnp.dot(dr * a1, eye * dr, preferred_element_type=f32)

        # --- three graph-conv layers: x <- relu((A @ x) @ Wk^T), last w/o relu ---
        x = feats[bi]
        x = jnp.maximum(
            jnp.dot(jnp.dot(a_norm, x, preferred_element_type=f32), w1t,
                    preferred_element_type=f32), 0.0)
        x = jnp.maximum(
            jnp.dot(jnp.dot(a_norm, x, preferred_element_type=f32), w2t,
                    preferred_element_type=f32), 0.0)
        x = jnp.dot(jnp.dot(a_norm, x, preferred_element_type=f32), w3t,
                    preferred_element_type=f32)                    # (n, C)

        # --- bilinear upsample (align_corners=True) as one MXU matmul ---
        o_ref[bi] = jnp.dot(b_up, x, preferred_element_type=f32)   # (H*W, C)


def _bilinear_matrix(n_out, n_in):
    """(n_out, n_in) matrix M s.t. M @ v is 1-D bilinear resize, align_corners=True."""
    m = np.zeros((n_out, n_in), dtype=np.float64)
    if n_in == 1 or n_out == 1:
        m[:, 0] = 1.0
        return m.astype(np.float32)
    scale = (n_in - 1) / (n_out - 1)
    for i in range(n_out):
        src = i * scale
        i0 = min(int(np.floor(src)), n_in - 1)
        i1 = min(i0 + 1, n_in - 1)
        f = src - i0
        m[i, i0] += 1.0 - f
        m[i, i1] += f
    return m.astype(np.float32)


def gcn_channel_forward(x_nchw, params):
    """GCNChannel forward.  x_nchw: (B, C, H, W) f32. Returns (B, C, H, W) f32."""
    conv_w, conv_b, bn_g, bn_b, bn_m, bn_v, w1, w2, w3 = params
    B, C, H, W = x_nchw.shape
    H1 = (H - 1) // 2 + 1
    W1 = (W - 1) // 2 + 1
    n = H1 * W1
    eps = 1e-5

    # ---- weights-only prep: fold BN into the input conv ----
    s = bn_g / jnp.sqrt(bn_v + eps)
    wf = conv_w * s[:, None, None, None]                       # (Co, Ci, 3, 3)
    bf = conv_b * s + (bn_b - bn_m * s)                        # (Co,)
    w_in = jnp.transpose(wf, (2, 3, 1, 0)).reshape(9 * C, C)   # row = (ky*3+kx)*C + ci
    w1t, w2t, w3t = w1.T, w2.T, w3.T                           # conv1d (out,in) -> (in,out)

    # ---- constants-only prep: separable Sobel band matrices + upsample matrix ----
    dx = np.zeros((C, C), np.float32)
    dy = np.zeros((C, C), np.float32)
    for j in range(C):
        dy[j, j] = 2.0
        if j + 1 < C:
            dx[j + 1, j] = 1.0
            dy[j + 1, j] = 1.0
        if j - 1 >= 0:
            dx[j - 1, j] = -1.0
            dy[j - 1, j] = 1.0
    b_up = np.kron(_bilinear_matrix(H, H1), _bilinear_matrix(W, W1)).astype(np.float32)

    # ---- layout-only prep: NHWC, zero pad, stride-2 im2col patches (B, n, 9C) ----
    x_nhwc = jnp.transpose(x_nchw, (0, 2, 3, 1))
    xpad = jnp.pad(x_nhwc, ((0, 0), (1, 1), (1, 1), (0, 0)))
    taps = []
    for ky in range(3):
        for kx in range(3):
            taps.append(xpad[:, ky:ky + 2 * H1 - 1:2, kx:kx + 2 * W1 - 1:2, :])
    patches = jnp.concatenate(taps, axis=-1).reshape(B, n, 9 * C)

    vspec = pl.BlockSpec(memory_space=pltpu.MemorySpace.VMEM)
    out_flat = pl.pallas_call(
        functools.partial(_gcn_channel_kernel, B, n, C),
        out_shape=jax.ShapeDtypeStruct((B, H * W, C), jnp.float32),
        in_specs=[vspec] * 9,
        out_specs=pl.BlockSpec(memory_space=pltpu.MemorySpace.VMEM),
        scratch_shapes=[pltpu.VMEM((n + 2, C), jnp.float32)],
    )(patches, w_in, bf.reshape(1, C), jnp.asarray(dx), jnp.asarray(dy),
      w1t, w2t, w3t, jnp.asarray(b_up))

    # (B, H*W, C) -> (B, C, H, W): layout-only post-processing.
    return jnp.transpose(out_flat.reshape(B, H, W, C), (0, 3, 1, 2))


# ------------------------- pure-JAX reference (module semantics) -------------------------

def _bilinear_align_corners_ref(x, out_h, out_w):
    B, C, h, w = x.shape

    def coords(n_out, n_in):
        if n_out == 1 or n_in == 1:
            z = jnp.zeros((n_out,), jnp.int32)
            return z, z, jnp.zeros((n_out,), jnp.float32)
        src = jnp.arange(n_out, dtype=jnp.float32) * ((n_in - 1) / (n_out - 1))
        i0 = jnp.clip(jnp.floor(src).astype(jnp.int32), 0, n_in - 1)
        i1 = jnp.clip(i0 + 1, 0, n_in - 1)
        return i0, i1, src - i0.astype(jnp.float32)

    y0, y1, fy = coords(out_h, h)
    x0, x1, fx = coords(out_w, w)
    top = (x[:, :, y0, :] * (1.0 - fy)[None, None, :, None]
           + x[:, :, y1, :] * fy[None, None, :, None])
    return (top[:, :, :, x0] * (1.0 - fx)[None, None, None, :]
            + top[:, :, :, x1] * fx[None, None, None, :])


def _reference(x_nchw, params):
    conv_w, conv_b, bn_g, bn_b, bn_m, bn_v, w1, w2, w3 = params
    hi = jax.lax.Precision.HIGHEST
    B, C, H, W = x_nchw.shape
    eps = 1e-5

    y = jax.lax.conv_general_dilated(
        x_nchw, conv_w, (2, 2), ((1, 1), (1, 1)),
        dimension_numbers=("NCHW", "OIHW", "NCHW"), precision=hi)
    y = y + conv_b[None, :, None, None]
    y = ((y - bn_m[None, :, None, None])
         * (bn_g / jnp.sqrt(bn_v + eps))[None, :, None, None]
         + bn_b[None, :, None, None])
    y = jnp.maximum(y, 0.0)
    _, _, H1, W1 = y.shape
    n = H1 * W1

    xp = jnp.transpose(y.reshape(B, C, n), (0, 2, 1))          # (B, n, C)  == pre(x)
    img = xp[:, None, :, :]                                    # (B, 1, n, C)
    kx = jnp.array([[-1., 0., 1.], [-2., 0., 2.], [-1., 0., 1.]], jnp.float32)[None, None]
    ky = jnp.array([[-1., -2., -1.], [0., 0., 0.], [1., 2., 1.]], jnp.float32)[None, None]
    gx = jnp.abs(jax.lax.conv_general_dilated(
        img, kx, (1, 1), ((1, 1), (1, 1)),
        dimension_numbers=("NCHW", "OIHW", "NCHW"), precision=hi))[:, 0]
    gy = jnp.abs(jax.lax.conv_general_dilated(
        img, ky, (1, 1), ((1, 1), (1, 1)),
        dimension_numbers=("NCHW", "OIHW", "NCHW"), precision=hi))[:, 0]
    s = jnp.einsum("bpc,bqc->bpq", gx, gy, precision=hi)
    # nn.Softmax() with no dim on a 3-D tensor -> legacy implicit dim 0 (batch axis).
    a = jax.nn.softmax(s, axis=0)

    eye = jnp.eye(n, dtype=jnp.float32)
    a1 = a + eye[None]
    d = jnp.sum(a1, axis=2)
    dinv = d ** -0.5
    a_norm = a1 * dinv[:, :, None] * dinv[:, None, :]

    x = xp
    for wk, act in ((w1, True), (w2, True), (w3, False)):
        ax = jnp.einsum("bpq,bqi->bpi", a_norm, x, precision=hi)
        x = jnp.einsum("bpi,oi->bpo", ax, wk, precision=hi)
        if act:
            x = jnp.maximum(x, 0.0)

    feat = jnp.transpose(x, (0, 2, 1)).reshape(B, C, H1, W1)
    return _bilinear_align_corners_ref(feat, H, W)


if __name__ == "__main__":
    B, C, H, W = 2, 4, 16, 16
    key = jax.random.PRNGKey(0)
    ks = jax.random.split(key, 10)

    x = jax.random.normal(ks[0], (B, C, H, W), dtype=jnp.float32)
    conv_w = 0.15 * jax.random.normal(ks[1], (C, C, 3, 3), dtype=jnp.float32)
    conv_b = 0.10 * jax.random.normal(ks[2], (C,), dtype=jnp.float32)
    bn_g = 0.5 + jax.random.uniform(ks[3], (C,), dtype=jnp.float32)
    bn_b = 0.10 * jax.random.normal(ks[4], (C,), dtype=jnp.float32)
    bn_m = 0.10 * jax.random.normal(ks[5], (C,), dtype=jnp.float32)
    bn_v = 0.5 + jax.random.uniform(ks[6], (C,), dtype=jnp.float32)
    fc1 = 0.25 * jax.random.normal(ks[7], (C, C), dtype=jnp.float32)
    fc2 = 0.25 * jax.random.normal(ks[8], (C, C), dtype=jnp.float32)
    fc3 = 0.25 * jax.random.normal(ks[9], (C, C), dtype=jnp.float32)
    params = (conv_w, conv_b, bn_g, bn_b, bn_m, bn_v, fc1, fc2, fc3)

    out = jax.block_until_ready(jax.jit(gcn_channel_forward)(x, params))
    ref = jax.block_until_ready(_reference(x, params))

    assert out.shape == (B, C, H, W), out.shape
    max_err = float(jnp.max(jnp.abs(out - ref)))
    assert jnp.allclose(out, ref, atol=2e-3, rtol=2e-3), f"max abs err = {max_err}"
    print("KERNEL_OK")
</pallas_src>

<mosaic_0001>
module attributes {stable_mosaic.version = 11 : i64} {
  func.func @_gcn_channel_kernel(%arg0: memref<2x64x36xf32, #tpu.memory_space<vmem>>, %arg1: memref<36x4xf32, #tpu.memory_space<vmem>>, %arg2: memref<1x4xf32, #tpu.memory_space<vmem>>, %arg3: memref<4x4xf32, #tpu.memory_space<vmem>>, %arg4: memref<4x4xf32, #tpu.memory_space<vmem>>, %arg5: memref<4x4xf32, #tpu.memory_space<vmem>>, %arg6: memref<4x4xf32, #tpu.memory_space<vmem>>, %arg7: memref<4x4xf32, #tpu.memory_space<vmem>>, %arg8: memref<256x64xf32, #tpu.memory_space<vmem>>, %arg9: memref<2x256x4xf32, #tpu.memory_space<vmem>>, %arg10: memref<66x4xf32, #tpu.memory_space<vmem>>) attributes {dimension_semantics = [], scalar_prefetch = 0 : i64, scratch_operands = 1 : i64, tpu.core_type = #tpu.core_type<tc>} {
    %c0 = arith.constant 0 : index
    %c0_0 = arith.constant 0 : index
    %0 = vector.load %arg1[%c0, %c0_0] : memref<36x4xf32, #tpu.memory_space<vmem>>, vector<36x4xf32>
    %c0_1 = arith.constant 0 : index
    %c0_2 = arith.constant 0 : index
    %1 = vector.load %arg2[%c0_1, %c0_2] : memref<1x4xf32, #tpu.memory_space<vmem>>, vector<1x4xf32>
    %c0_3 = arith.constant 0 : index
    %c0_4 = arith.constant 0 : index
    %2 = vector.load %arg3[%c0_3, %c0_4] : memref<4x4xf32, #tpu.memory_space<vmem>>, vector<4x4xf32>
    %c0_5 = arith.constant 0 : index
    %c0_6 = arith.constant 0 : index
    %3 = vector.load %arg4[%c0_5, %c0_6] : memref<4x4xf32, #tpu.memory_space<vmem>>, vector<4x4xf32>
    %c0_7 = arith.constant 0 : index
    %c0_8 = arith.constant 0 : index
    %4 = vector.load %arg5[%c0_7, %c0_8] : memref<4x4xf32, #tpu.memory_space<vmem>>, vector<4x4xf32>
    %c0_9 = arith.constant 0 : index
    %c0_10 = arith.constant 0 : index
    %5 = vector.load %arg6[%c0_9, %c0_10] : memref<4x4xf32, #tpu.memory_space<vmem>>, vector<4x4xf32>
    %c0_11 = arith.constant 0 : index
    %c0_12 = arith.constant 0 : index
    %6 = vector.load %arg7[%c0_11, %c0_12] : memref<4x4xf32, #tpu.memory_space<vmem>>, vector<4x4xf32>
    %c0_13 = arith.constant 0 : index
    %c0_14 = arith.constant 0 : index
    %7 = vector.load %arg8[%c0_13, %c0_14] : memref<256x64xf32, #tpu.memory_space<vmem>>, vector<256x64xf32>
    %8 = tpu.iota {dimensions = array<i32: 0>} : vector<64x64xi32>
    %9 = tpu.iota {dimensions = array<i32: 1>} : vector<64x64xi32>
    %10 = arith.cmpi eq, %8, %9 : vector<64x64xi32>
    %11 = arith.extui %10 : vector<64x64xi1> to vector<64x64xi32>
    %12 = arith.sitofp %11 : vector<64x64xi32> to vector<64x64xf32>
    %cst = arith.constant 0.000000e+00 : f32
    %13 = vector.broadcast %cst : f32 to vector<66x4xf32>
    %c0_15 = arith.constant 0 : index
    %c0_16 = arith.constant 0 : index
    %14 = vector.load %arg10[%c0_15, %c0_16] : memref<66x4xf32, #tpu.memory_space<vmem>>, vector<66x4xf32>
    tpu.vector_store %arg10[%c0_15, %c0_16], %13 {strides = array<i32>} : memref<66x4xf32, #tpu.memory_space<vmem>>, vector<66x4xf32>,
    %c0_17 = arith.constant 0 : index
    %c0_18 = arith.constant 0 : index
    %c0_19 = arith.constant 0 : index
    %15 = vector.load %arg0[%c0_17, %c0_18, %c0_19] : memref<2x64x36xf32, #tpu.memory_space<vmem>>, vector<1x64x36xf32>
    %16 = vector.shape_cast %15 : vector<1x64x36xf32> to vector<64x36xf32>
    %cst_20 = arith.constant dense<0.000000e+00> : vector<64x4xf32>
    %17 = tpu.matmul %16, %0, %cst_20 {dimension_numbers = #tpu.dot_dimension_numbers<[1], [0], [0], [1], [0, 0, 1, 1], [], []>} : vector<64x36xf32>, vector<36x4xf32>, vector<64x4xf32> -> vector<64x4xf32>
    %18 = vector.broadcast %1 : vector<1x4xf32> to vector<64x4xf32>
    %19 = arith.addf %17, %18 : vector<64x4xf32>
    %cst_21 = arith.constant 0.000000e+00 : f32
    %20 = vector.broadcast %cst_21 : f32 to vector<64x4xf32>
    %21 = arith.maximumf %19, %20 : vector<64x4xf32>
    %c1 = arith.constant 1 : index
    %c0_22 = arith.constant 0 : index
    %22 = vector.load %arg10[%c1, %c0_22] : memref<66x4xf32, #tpu.memory_space<vmem>>, vector<64x4xf32>
    tpu.vector_store %arg10[%c1, %c0_22], %21 {strides = array<i32>} : memref<66x4xf32, #tpu.memory_space<vmem>>, vector<64x4xf32>,
    %c0_23 = arith.constant 0 : index
    %c0_24 = arith.constant 0 : index
    %23 = vector.load %arg10[%c0_23, %c0_24] : memref<66x4xf32, #tpu.memory_space<vmem>>, vector<64x4xf32>
    %c1_25 = arith.constant 1 : index
    %c0_26 = arith.constant 0 : index
    %24 = vector.load %arg10[%c1_25, %c0_26] : memref<66x4xf32, #tpu.memory_space<vmem>>, vector<64x4xf32>
    %c2 = arith.constant 2 : index
    %c0_27 = arith.constant 0 : index
    %25 = vector.load %arg10[%c2, %c0_27] : memref<66x4xf32, #tpu.memory_space<vmem>>, vector<64x4xf32>
    %cst_28 = arith.constant 2.000000e+00 : f32
    %26 = vector.broadcast %cst_28 : f32 to vector<64x4xf32>
    %27 = arith.mulf %26, %24 : vector<64x4xf32>
    %28 = arith.addf %23, %27 : vector<64x4xf32>
    %29 = arith.addf %28, %25 : vector<64x4xf32>
    %cst_29 = arith.constant dense<0.000000e+00> : vector<64x4xf32>
    %30 = tpu.matmul %29, %2, %cst_29 {dimension_numbers = #tpu.dot_dimension_numbers<[1], [0], [0], [1], [0, 0, 1, 1], [], []>} : vector<64x4xf32>, vector<4x4xf32>, vector<64x4xf32> -> vector<64x4xf32>
    %31 = math.absf %30 : vector<64x4xf32>
    %32 = arith.subf %25, %23 : vector<64x4xf32>
    %cst_30 = arith.constant dense<0.000000e+00> : vector<64x4xf32>
    %33 = tpu.matmul %32, %3, %cst_30 {dimension_numbers = #tpu.dot_dimension_numbers<[1], [0], [0], [1], [0, 0, 1, 1], [], []>} : vector<64x4xf32>, vector<4x4xf32>, vector<64x4xf32> -> vector<64x4xf32>
    %34 = math.absf %33 : vector<64x4xf32>
    %cst_31 = arith.constant dense<0.000000e+00> : vector<64x64xf32>
    %35 = tpu.matmul %31, %34, %cst_31 {dimension_numbers = #tpu.dot_dimension_numbers<[1], [1], [0], [0], [0, 0, 1, 0], [], []>} : vector<64x4xf32>, vector<64x4xf32>, vector<64x64xf32> -> vector<64x64xf32>
    %c1_32 = arith.constant 1 : index
    %c0_33 = arith.constant 0 : index
    %c0_34 = arith.constant 0 : index
    %36 = vector.load %arg0[%c1_32, %c0_33, %c0_34] : memref<2x64x36xf32, #tpu.memory_space<vmem>>, vector<1x64x36xf32>
    %37 = vector.shape_cast %36 : vector<1x64x36xf32> to vector<64x36xf32>
    %cst_35 = arith.constant dense<0.000000e+00> : vector<64x4xf32>
    %38 = tpu.matmul %37, %0, %cst_35 {dimension_numbers = #tpu.dot_dimension_numbers<[1], [0], [0], [1], [0, 0, 1, 1], [], []>} : vector<64x36xf32>, vector<36x4xf32>, vector<64x4xf32> -> vector<64x4xf32>
    %39 = vector.broadcast %1 : vector<1x4xf32> to vector<64x4xf32>
    %40 = arith.addf %38, %39 : vector<64x4xf32>
    %cst_36 = arith.constant 0.000000e+00 : f32
    %41 = vector.broadcast %cst_36 : f32 to vector<64x4xf32>
    %42 = arith.maximumf %40, %41 : vector<64x4xf32>
    %c1_37 = arith.constant 1 : index
    %c0_38 = arith.constant 0 : index
    %43 = vector.load %arg10[%c1_37, %c0_38] : memref<66x4xf32, #tpu.memory_space<vmem>>, vector<64x4xf32>
    tpu.vector_store %arg10[%c1_37, %c0_38], %42 {strides = array<i32>} : memref<66x4xf32, #tpu.memory_space<vmem>>, vector<64x4xf32>,
    %c0_39 = arith.constant 0 : index
    %c0_40 = arith.constant 0 : index
    %44 = vector.load %arg10[%c0_39, %c0_40] : memref<66x4xf32, #tpu.memory_space<vmem>>, vector<64x4xf32>
    %c1_41 = arith.constant 1 : index
    %c0_42 = arith.constant 0 : index
    %45 = vector.load %arg10[%c1_41, %c0_42] : memref<66x4xf32, #tpu.memory_space<vmem>>, vector<64x4xf32>
    %c2_43 = arith.constant 2 : index
    %c0_44 = arith.constant 0 : index
    %46 = vector.load %arg10[%c2_43, %c0_44] : memref<66x4xf32, #tpu.memory_space<vmem>>, vector<64x4xf32>
    %cst_45 = arith.constant 2.000000e+00 : f32
    %47 = vector.broadcast %cst_45 : f32 to vector<64x4xf32>
    %48 = arith.mulf %47, %45 : vector<64x4xf32>
    %49 = arith.addf %44, %48 : vector<64x4xf32>
    %50 = arith.addf %49, %46 : vector<64x4xf32>
    %cst_46 = arith.constant dense<0.000000e+00> : vector<64x4xf32>
    %51 = tpu.matmul %50, %2, %cst_46 {dimension_numbers = #tpu.dot_dimension_numbers<[1], [0], [0], [1], [0, 0, 1, 1], [], []>} : vector<64x4xf32>, vector<4x4xf32>, vector<64x4xf32> -> vector<64x4xf32>
    %52 = math.absf %51 : vector<64x4xf32>
    %53 = arith.subf %46, %44 : vector<64x4xf32>
    %cst_47 = arith.constant dense<0.000000e+00> : vector<64x4xf32>
    %54 = tpu.matmul %53, %3, %cst_47 {dimension_numbers = #tpu.dot_dimension_numbers<[1], [0], [0], [1], [0, 0, 1, 1], [], []>} : vector<64x4xf32>, vector<4x4xf32>, vector<64x4xf32> -> vector<64x4xf32>
    %55 = math.absf %54 : vector<64x4xf32>
    %cst_48 = arith.constant dense<0.000000e+00> : vector<64x64xf32>
    %56 = tpu.matmul %52, %55, %cst_48 {dimension_numbers = #tpu.dot_dimension_numbers<[1], [1], [0], [0], [0, 0, 1, 0], [], []>} : vector<64x4xf32>, vector<64x4xf32>, vector<64x64xf32> -> vector<64x64xf32>
    %57 = arith.maximumf %35, %56 : vector<64x64xf32>
    %58 = arith.subf %35, %57 : vector<64x64xf32>
    %59 = math.exp %58 : vector<64x64xf32>
    %60 = arith.subf %56, %57 : vector<64x64xf32>
    %61 = math.exp %60 : vector<64x64xf32>
    %62 = arith.addf %59, %61 : vector<64x64xf32>
    %cst_49 = arith.constant 1.000000e+00 : f32
    %63 = vector.broadcast %cst_49 : f32 to vector<64x64xf32>
    %64 = arith.divf %63, %62 : vector<64x64xf32>
    %65 = arith.mulf %59, %64 : vector<64x64xf32>
    %66 = arith.addf %65, %12 : vector<64x64xf32>
    %cst_50 = arith.constant dense<0.000000e+00> : vector<64xf32>
    %67 = vector.multi_reduction <add>, %66, %cst_50 [1] : vector<64x64xf32> to vector<64xf32>
    %68 = vector.shape_cast %67 : vector<64xf32> to vector<64x1xf32>
    %69 = math.rsqrt %68 : vector<64x1xf32>
    %70 = vector.broadcast %69 : vector<64x1xf32> to vector<64x64xf32>
    %71 = arith.mulf %70, %66 : vector<64x64xf32>
    %72 = vector.broadcast %69 : vector<64x1xf32> to vector<64x64xf32>
    %73 = arith.mulf %12, %72 : vector<64x64xf32>
    %cst_51 = arith.constant dense<0.000000e+00> : vector<64x64xf32>
    %74 = tpu.matmul %71, %73, %cst_51 {dimension_numbers = #tpu.dot_dimension_numbers<[1], [0], [0], [1], [0, 0, 1, 1], [], []>} : vector<64x64xf32>, vector<64x64xf32>, vector<64x64xf32> -> vector<64x64xf32>
    %cst_52 = arith.constant dense<0.000000e+00> : vector<64x4xf32>
    %75 = tpu.matmul %74, %21, %cst_52 {dimension_numbers = #tpu.dot_dimension_numbers<[1], [0], [0], [1], [0, 0, 1, 1], [], []>} : vector<64x64xf32>, vector<64x4xf32>, vector<64x4xf32> -> vector<64x4xf32>
    %cst_53 = arith.constant dense<0.000000e+00> : vector<64x4xf32>
    %76 = tpu.matmul %75, %4, %cst_53 {dimension_numbers = #tpu.dot_dimension_numbers<[1], [0], [0], [1], [0, 0, 1, 1], [], []>} : vector<64x4xf32>, vector<4x4xf32>, vector<64x4xf32> -> vector<64x4xf32>
    %cst_54 = arith.constant 0.000000e+00 : f32
    %77 = vector.broadcast %cst_54 : f32 to vector<64x4xf32>
    %78 = arith.maximumf %76, %77 : vector<64x4xf32>
    %cst_55 = arith.constant dense<0.000000e+00> : vector<64x4xf32>
    %79 = tpu.matmul %74, %78, %cst_55 {dimension_numbers = #tpu.dot_dimension_numbers<[1], [0], [0], [1], [0, 0, 1, 1], [], []>} : vector<64x64xf32>, vector<64x4xf32>, vector<64x4xf32> -> vector<64x4xf32>
    %cst_56 = arith.constant dense<0.000000e+00> : vector<64x4xf32>
    %80 = tpu.matmul %79, %5, %cst_56 {dimension_numbers = #tpu.dot_dimension_numbers<[1], [0], [0], [1], [0, 0, 1, 1], [], []>} : vector<64x4xf32>, vector<4x4xf32>, vector<64x4xf32> -> vector<64x4xf32>
    %cst_57 = arith.constant 0.000000e+00 : f32
    %81 = vector.broadcast %cst_57 : f32 to vector<64x4xf32>
    %82 = arith.maximumf %80, %81 : vector<64x4xf32>
    %cst_58 = arith.constant dense<0.000000e+00> : vector<64x4xf32>
    %83 = tpu.matmul %74, %82, %cst_58 {dimension_numbers = #tpu.dot_dimension_numbers<[1], [0], [0], [1], [0, 0, 1, 1], [], []>} : vector<64x64xf32>, vector<64x4xf32>, vector<64x4xf32> -> vector<64x4xf32>
    %cst_59 = arith.constant dense<0.000000e+00> : vector<64x4xf32>
    %84 = tpu.matmul %83, %6, %cst_59 {dimension_numbers = #tpu.dot_dimension_numbers<[1], [0], [0], [1], [0, 0, 1, 1], [], []>} : vector<64x4xf32>, vector<4x4xf32>, vector<64x4xf32> -> vector<64x4xf32>
    %cst_60 = arith.constant dense<0.000000e+00> : vector<256x4xf32>
    %85 = tpu.matmul %7, %84, %cst_60 {dimension_numbers = #tpu.dot_dimension_numbers<[1], [0], [0], [1], [0, 0, 1, 1], [], []>} : vector<256x64xf32>, vector<64x4xf32>, vector<256x4xf32> -> vector<256x4xf32>
    %c0_61 = arith.constant 0 : index
    %c0_62 = arith.constant 0 : index
    %c0_63 = arith.constant 0 : index
    %86 = vector.load %arg9[%c0_61, %c0_62, %c0_63] : memref<2x256x4xf32, #tpu.memory_space<vmem>>, vector<1x256x4xf32>
    %87 = vector.shape_cast %86 : vector<1x256x4xf32> to vector<256x4xf32>
    %88 = vector.shape_cast %85 : vector<256x4xf32> to vector<1x256x4xf32>
    tpu.vector_store %arg9[%c0_61, %c0_62, %c0_63], %88 {strides = array<i32>} : memref<2x256x4xf32, #tpu.memory_space<vmem>>, vector<1x256x4xf32>,
    %89 = arith.mulf %61, %64 : vector<64x64xf32>
    %90 = arith.addf %89, %12 : vector<64x64xf32>
    %cst_64 = arith.constant dense<0.000000e+00> : vector<64xf32>
    %91 = vector.multi_reduction <add>, %90, %cst_64 [1] : vector<64x64xf32> to vector<64xf32>
    %92 = vector.shape_cast %91 : vector<64xf32> to vector<64x1xf32>
    %93 = math.rsqrt %92 : vector<64x1xf32>
    %94 = vector.broadcast %93 : vector<64x1xf32> to vector<64x64xf32>
    %95 = arith.mulf %94, %90 : vector<64x64xf32>
    %96 = vector.broadcast %93 : vector<64x1xf32> to vector<64x64xf32>
    %97 = arith.mulf %12, %96 : vector<64x64xf32>
    %cst_65 = arith.constant dense<0.000000e+00> : vector<64x64xf32>
    %98 = tpu.matmul %95, %97, %cst_65 {dimension_numbers = #tpu.dot_dimension_numbers<[1], [0], [0], [1], [0, 0, 1, 1], [], []>} : vector<64x64xf32>, vector<64x64xf32>, vector<64x64xf32> -> vector<64x64xf32>
    %cst_66 = arith.constant dense<0.000000e+00> : vector<64x4xf32>
    %99 = tpu.matmul %98, %42, %cst_66 {dimension_numbers = #tpu.dot_dimension_numbers<[1], [0], [0], [1], [0, 0, 1, 1], [], []>} : vector<64x64xf32>, vector<64x4xf32>, vector<64x4xf32> -> vector<64x4xf32>
    %cst_67 = arith.constant dense<0.000000e+00> : vector<64x4xf32>
    %100 = tpu.matmul %99, %4, %cst_67 {dimension_numbers = #tpu.dot_dimension_numbers<[1], [0], [0], [1], [0, 0, 1, 1], [], []>} : vector<64x4xf32>, vector<4x4xf32>, vector<64x4xf32> -> vector<64x4xf32>
    %cst_68 = arith.constant 0.000000e+00 : f32
    %101 = vector.broadcast %cst_68 : f32 to vector<64x4xf32>
    %102 = arith.maximumf %100, %101 : vector<64x4xf32>
    %cst_69 = arith.constant dense<0.000000e+00> : vector<64x4xf32>
    %103 = tpu.matmul %98, %102, %cst_69 {dimension_numbers = #tpu.dot_dimension_numbers<[1], [0], [0], [1], [0, 0, 1, 1], [], []>} : vector<64x64xf32>, vector<64x4xf32>, vector<64x4xf32> -> vector<64x4xf32>
    %cst_70 = arith.constant dense<0.000000e+00> : vector<64x4xf32>
    %104 = tpu.matmul %103, %5, %cst_70 {dimension_numbers = #tpu.dot_dimension_numbers<[1], [0], [0], [1], [0, 0, 1, 1], [], []>} : vector<64x4xf32>, vector<4x4xf32>, vector<64x4xf32> -> vector<64x4xf32>
    %cst_71 = arith.constant 0.000000e+00 : f32
    %105 = vector.broadcast %cst_71 : f32 to vector<64x4xf32>
    %106 = arith.maximumf %104, %105 : vector<64x4xf32>
    %cst_72 = arith.constant dense<0.000000e+00> : vector<64x4xf32>
    %107 = tpu.matmul %98, %106, %cst_72 {dimension_numbers = #tpu.dot_dimension_numbers<[1], [0], [0], [1], [0, 0, 1, 1], [], []>} : vector<64x64xf32>, vector<64x4xf32>, vector<64x4xf32> -> vector<64x4xf32>
    %cst_73 = arith.constant dense<0.000000e+00> : vector<64x4xf32>
    %108 = tpu.matmul %107, %6, %cst_73 {dimension_numbers = #tpu.dot_dimension_numbers<[1], [0], [0], [1], [0, 0, 1, 1], [], []>} : vector<64x4xf32>, vector<4x4xf32>, vector<64x4xf32> -> vector<64x4xf32>
    %cst_74 = arith.constant dense<0.000000e+00> : vector<256x4xf32>
    %109 = tpu.matmul %7, %108, %cst_74 {dimension_numbers = #tpu.dot_dimension_numbers<[1], [0], [0], [1], [0, 0, 1, 1], [], []>} : vector<256x64xf32>, vector<64x4xf32>, vector<256x4xf32> -> vector<256x4xf32>
    %c1_75 = arith.constant 1 : index
    %c0_76 = arith.constant 0 : index
    %c0_77 = arith.constant 0 : index
    %110 = vector.load %arg9[%c1_75, %c0_76, %c0_77] : memref<2x256x4xf32, #tpu.memory_space<vmem>>, vector<1x256x4xf32>
    %111 = vector.shape_cast %110 : vector<1x256x4xf32> to vector<256x4xf32>
    %112 = vector.shape_cast %109 : vector<256x4xf32> to vector<1x256x4xf32>
    tpu.vector_store %arg9[%c1_75, %c0_76, %c0_77], %112 {strides = array<i32>} : memref<2x256x4xf32, #tpu.memory_space<vmem>>, vector<1x256x4xf32>,
    return
  }
}

</mosaic_0001>

<bundles_post_ra>
// kernel: gcn_channel_forward.1
= control target key start
LH: loop header
LB: loop body
LE: loop exit
PB: predicated region body
PF: predicated region fallthrough
CT: control target
= control target key end

     0   :  { %vm157_vm0 = vcmask 1043456   ;;  %vm110_vm1 = vcmask 31744   ;;  %v3015_v4 = vmov 0.0   ;;  %vm132_vm2 = vcmask 293888   ;;  %s4672_s1 = inlined_call_operand.vmem [shape: f32[36,4], index: 1, kind: input, shape index: {}]   ;;  %s4673_s0 = inlined_call_operand.vmem [shape: f32[2,64,36], index: 0, kind: input, shape index: {}]   ;;  %s4674_s4 = inlined_call_operand.vmem [shape: f32[4,4], index: 4, kind: input, shape index: {}]   ;;  %s4675_s3 = inlined_call_operand.vmem [shape: f32[4,4], index: 3, kind: input, shape index: {}]   ;;  %s4676_s2 = inlined_call_operand.vmem [shape: f32[1,4], index: 2, kind: input, shape index: {}]   ;;  %s4677_s6 = inlined_call_operand.vmem [shape: f32[4,4], index: 6, kind: input, shape index: {}]   ;;  %s4678_s5 = inlined_call_operand.vmem [shape: f32[4,4], index: 5, kind: input, shape index: {}]   ;;  %s4679_s7 = inlined_call_operand.vmem [shape: f32[4,4], index: 7, kind: input, shape index: {}]   ;;  %s4680_s8 = inlined_call_operand.vmem [shape: f32[256,64], index: 8, kind: input, shape index: {}]   ;;  %s4681_s9 = inlined_call_operand.vmem [shape: f32[2,256,4], index: 9, kind: output, shape index: {}]  }
   0x1   :  { %v36_v0 = vld [vmem:[%s4672_s1 + $0x20] sm:$0xf]  ;;  %v35_v1 = vld [vmem:[%s4672_s1 + $0x18] sm:$0xff]  ;;  %v34_v2 = vld [vmem:[%s4672_s1 + $0x10] sm:$0xff]  ;;  %111 = vst.msk [vmem:[#allocation2] sm:$0xff] %vm110_vm1, %v3015_v4  ;;  %vm119_vm3 = vcmask 25600  }
   0x2   :  { %2607 = vmatpush.msk.msra.mxu0 %vm157_vm0, %v36_v0  ;;  %2915 = vmatpush.msk.msra.mxu1 %vm157_vm0, %v36_v0  ;;  %v33_v3 = vld [vmem:[%s4672_s1 + $0x8] sm:$0xff]  ;;  %112 = vst.msk [vmem:[#allocation2 + $0x8] sm:$0xff] %vm110_vm1, %v3015_v4  ;;  %v32_v5 = vld [vmem:[%s4672_s1] sm:$0xff]  ;;  %v123_v9 = vld [vmem:[%s4673_s0 + $0x10] sm:$0xff]  ;;  %vm1096_vm14 = vcmask 523264  }
   0x3   :  { %2916 = vmatpush.msk.msra.mxu3 %vm157_vm0, %v36_v0  ;;  %113 = vst.msk [vmem:[#allocation2 + $0x10] sm:$0xff] %vm110_vm1, %v3015_v4  ;;  %v121_v6 = vld [vmem:[%s4673_s0] sm:$0xff]  ;;  %v122_v7 = vld [vmem:[%s4673_s0 + $0x8] sm:$0xff]  ;;  %v127_v10 = vld [vmem:[%s4673_s0 + $0x30] sm:$0xff] }
   0x4   :  { %173 = vmatpush.msra.mxu0 %v35_v1  ;;  %2917 = vmatpush.msra.mxu1 %v35_v1  ;;  %114 = vst.msk [vmem:[#allocation2 + $0x18] sm:$0xff] %vm110_vm1, %v3015_v4  ;;  %v126_v8 = vld [vmem:[%s4673_s0 + $0x28] sm:$0xff]  ;;  %v124_v11 = vld [vmem:[%s4673_s0 + $0x18] sm:$0xff]  ;;  %v125_v13 = vld [vmem:[%s4673_s0 + $0x20] sm:$0xff] }
   0x5   :  { %2918 = vmatpush.msra.mxu3 %v35_v1  ;;  %115 = vst.msk [vmem:[#allocation2 + $0x20] sm:$0xff] %vm110_vm1, %v3015_v4  ;;  %v128_v12 = vld [vmem:[%s4673_s0 + $0x38] sm:$0xff]  ;;  %v39_v14 = vld [vmem:[%s4674_s4] sm:$0xf] }
   0x6   :  { %174 = vmatpush.msra.mxu0 %v34_v2  ;;  %2919 = vmatpush.msra.mxu1 %v34_v2  ;;  %116 = vst.msk [vmem:[#allocation2 + $0x28] sm:$0xff] %vm110_vm1, %v3015_v4  ;;  %v38_v15 = vld [vmem:[%s4675_s3] sm:$0xf] }
   0x7   :  { %2920 = vmatpush.msra.mxu3 %v34_v2  ;;  %117 = vst.msk [vmem:[#allocation2 + $0x30] sm:$0xff] %vm110_vm1, %v3015_v4  ;;  %2925 = vmatpush.msk.msra.mxu2 %vm157_vm0, %v39_v14  ;;  %v37_v16 = vld [vmem:[%s4676_s2] sm:$0x1] }
   0x8   :  { %175 = vmatpush.msra.mxu0 %v33_v3  ;;  %2921 = vmatpush.msra.mxu1 %v33_v3  ;;  %118 = vst.msk [vmem:[#allocation2 + $0x38] sm:$0xff] %vm110_vm1, %v3015_v4  ;;  %v3148_v17 = vperm.slane %v37_v16, 0 }
   0x9   :  { %2922 = vmatpush.msra.mxu3 %v33_v3  ;;  %2667 = vmatpush.msk.msrb.mxu2 %vm157_vm0, %v38_v15  ;;  %120 = vst.msk [vmem:[#allocation2 + $0x40] sm:$0x3] %vm119_vm3, %v3015_v4 }
   0xa   :  { %176 = vmatpush.msra.mxu0 %v32_v5  ;;  %2923 = vmatpush.msra.mxu1 %v32_v5 }
   0xb   :  { %2924 = vmatpush.msra.mxu3 %v32_v5  ;;  %2608 = vmatmul.msk.f32.vlgmr.msra.gmra.mxu0 %vm132_vm2, %v121_v6 }
   0xc   :  { %2609 = vmatmul.msk.f32.vlgmr.msra.gmra.mxu1 %vm132_vm2, %v122_v7  ;;  %2613 = vmatmul.msk.f32.vlgmr.msra.gmra.mxu3 %vm132_vm2, %v126_v8 }
   0xd   :  { %2625 = vmatpush.msk.msrb.mxu0 %vm157_vm0, %v39_v14  ;;  %2616 = vmatpush.msk.msrb.mxu1 %vm157_vm0, %v38_v15 }
   0xf   :  { %2676 = vmatpush.msk.msra.mxu0 %vm157_vm0, %v39_v14  ;;  %2658 = vmatpush.msk.msra.mxu1 %vm157_vm0, %v36_v0 }
  0x11   :  { %560 = vmatpush.msra.mxu1 %v35_v1 }
  0x13   :  { %561 = vmatpush.msra.mxu1 %v34_v2 }
  0x14   :  { %2610 = vmatmul.msk.f32.gmra.mxu1 %vm132_vm2, %v123_v9  ;;  %2614 = vmatmul.msk.f32.gmra.mxu3 %vm132_vm2, %v127_v10 }
  0x15   :  { %562 = vmatpush.msra.mxu1 %v33_v3 }
  0x17   :  { %563 = vmatpush.msra.mxu1 %v32_v5 }
  0x1c   :  { %2611 = vmatmul.msk.f32.gmra.mxu1 %vm132_vm2, %v124_v11  ;;  %2615 = vmatmul.msk.f32.gmra.mxu3 %vm132_vm2, %v128_v12 }
  0x24   :  { %2612 = vmatmul.msk.f32.gmra.mxu1 %vm132_vm2, %v125_v13 }
  0x88   :  { %v178_v18 = vpop.f32.mrf.mxu0 }
  0x89   :  { %v3151_v19 = vadd.f32 %v178_v18, %v3148_v17  ;;  %v181_v20 = vpop.f32.mrf.mxu1 }
  0x8a   :  { %v3154_v21 = vadd.f32 %v181_v20, %v3148_v17 }
  0x8b   :  { %v202_v22 = vmax.f32 %v3151_v19, 0.0 }
  0x8c   :  { %v203_v23 = vmax.f32 %v3154_v21, 0.0 }
  0x8d   :  { %210 = vst.msk [vmem:[#allocation2 + $0x1] sm:$0xff] %vm110_vm1, %v202_v22 }
  0x8e   :  { %211 = vst.msk [vmem:[#allocation2 + $0x9] sm:$0xff] %vm110_vm1, %v203_v23 }
  0x8f   :  { %v193_v24 = vpop.f32.mrf.mxu3 }
  0x90   :  { %v194_v25 = vadd.f32 %v193_v24, %v3148_v17 }
  0x91   :  { %v184_v26 = vpop.f32.mrf.mxu1 }
  0x92   :  { %v207_v27 = vmax.f32 %v194_v25, 0.0  ;;  %v185_v28 = vadd.f32 %v184_v26, %v3148_v17 }
  0x94   :  { %215 = vst.msk [vmem:[#allocation2 + $0x29] sm:$0xff] %vm110_vm1, %v207_v27  ;;  %v204_v29 = vmax.f32 %v185_v28, 0.0  ;;  %v218_v30 = vld [vmem:[#allocation2] sm:$0xff] }
  0x95   :  { %v226_v31 = vld [vmem:[#allocation2 + $0x1] sm:$0xff]  ;;  %v227_v38 = vld [vmem:[#allocation2 + $0x9] sm:$0xff] }
  0x96   :  { %v234_v32 = vld [vmem:[#allocation2 + $0x2] sm:$0xff]  ;;  %v242_v33 = vmul.f32 2.0, %v226_v31  ;;  %212 = vst.msk [vmem:[#allocation2 + $0x11] sm:$0xff] %vm110_vm1, %v204_v29  ;;  %v243_v43 = vmul.f32 2.0, %v227_v38  ;;  %v2652_v38 = vld [vmem:[%s4673_s0 + $0x50] sm:$0xff] }
  0x97   :  { %v342_v34 = vsub.f32 %v234_v32, %v218_v30  ;;  %v196_v35 = vpop.f32.mrf.mxu3  ;;  %v219_v45 = vld [vmem:[#allocation2 + $0x8] sm:$0xff] }
  0x98   :  { %v250_v36 = vadd.f32 %v242_v33, %v218_v30  ;;  %v197_v37 = vadd.f32 %v196_v35, %v3148_v17  ;;  %v251_v49 = vadd.f32 %v243_v43, %v219_v45  ;;  %v2657_v43 = vld [vmem:[%s4673_s0 + $0x78] sm:$0xff] }
  0x99   :  { %2626 = vmatmul.msk.f32.vlgmr.msrb.gmra.mxu0 %vm110_vm1, %v342_v34  ;;  %v187_v39 = vpop.f32.mrf.mxu1 }
  0x9a   :  { %v258_v40 = vadd.f32 %v250_v36, %v234_v32  ;;  %v208_v41 = vmax.f32 %v197_v37, 0.0  ;;  %v188_v42 = vadd.f32 %v187_v39, %v3148_v17  ;;  %v2650_v36 = vld [vmem:[%s4673_s0 + $0x40] sm:$0xff]  ;;  %v2651_v37 = vld [vmem:[%s4673_s0 + $0x48] sm:$0xff]  ;;  %v2653_v39 = vld [vmem:[%s4673_s0 + $0x58] sm:$0xff] }
  0x9b   :  { %v231_v13 = vld [vmem:[#allocation2 + $0x29] sm:$0xff] }
  0x9c   :  { %2617 = vmatmul.msk.f32.vlgmr.msrb.gmra.mxu1 %vm110_vm1, %v258_v40  ;;  %216 = vst.msk [vmem:[#allocation2 + $0x31] sm:$0xff] %vm110_vm1, %v208_v41  ;;  %v205_v44 = vmax.f32 %v188_v42, 0.0  ;;  %v247_v15 = vmul.f32 2.0, %v231_v13  ;;  %v2654_v40 = vld [vmem:[%s4673_s0 + $0x60] sm:$0xff]  ;;  %v2656_v42 = vld [vmem:[%s4673_s0 + $0x70] sm:$0xff] }
  0x9d   :  { %v235_v46 = vld [vmem:[#allocation2 + $0xa] sm:$0xff] }
  0x9e   :  { %213 = vst.msk [vmem:[#allocation2 + $0x19] sm:$0xff] %vm110_vm1, %v205_v44  ;;  %v343_v47 = vsub.f32 %v235_v46, %v219_v45  ;;  %v228_v51 = vld [vmem:[#allocation2 + $0x11] sm:$0xff]  ;;  %v259_v53 = vadd.f32 %v251_v49, %v235_v46 }
  0x9f   :  { %v199_v48 = vpop.f32.mrf.mxu3  ;;  %v244_v56 = vmul.f32 2.0, %v228_v51  ;;  %v220_v58 = vld [vmem:[#allocation2 + $0x10] sm:$0xff] }
  0xa0   :  { %v200_v50 = vadd.f32 %v199_v48, %v3148_v17  ;;  %2627 = vmatmul.msk.f32.vlgmr.msra.gmra.mxu2 %vm110_vm1, %v343_v47 }
  0xa1   :  { %v190_v52 = vpop.f32.mrf.mxu1  ;;  %v252_v61 = vadd.f32 %v244_v56, %v220_v58 }
  0xa2   :  { %v209_v54 = vmax.f32 %v200_v50, 0.0  ;;  %v191_v55 = vadd.f32 %v190_v52, %v3148_v17 }
  0xa3   :  { %v239_v18 = vld [vmem:[#allocation2 + $0x2a] sm:$0xff] }
  0xa4   :  { %2618 = vmatmul.msk.f32.gmra.mxu1 %vm110_vm1, %v259_v53  ;;  %217 = vst.msk [vmem:[#allocation2 + $0x39] sm:$0xff] %vm110_vm1, %v209_v54  ;;  %v206_v57 = vmax.f32 %v191_v55, 0.0  ;;  %1314 = vmatpush.msra.mxu2 %v209_v54  ;;  %v224_v24 = vld [vmem:[#allocation2 + $0x30] sm:$0xff] }
  0xa5   :  { %v236_v59 = vld [vmem:[#allocation2 + $0x12] sm:$0xff] }
  0xa6   :  { %214 = vst.msk [vmem:[#allocation2 + $0x21] sm:$0xff] %vm110_vm1, %v206_v57  ;;  %1315 = vmatpush.msra.mxu2 %v208_v41  ;;  %v344_v60 = vsub.f32 %v236_v59, %v220_v58  ;;  %v229_v62 = vld [vmem:[#allocation2 + $0x19] sm:$0xff]  ;;  %v260_v63 = vadd.f32 %v252_v61, %v236_v59  ;;  %v2655_v41 = vld [vmem:[%s4673_s0 + $0x68] sm:$0xff] }
  0xa7   :  { %v245_v0 = vmul.f32 2.0, %v229_v62  ;;  %v221_v1 = vld [vmem:[#allocation2 + $0x18] sm:$0xff] }
  0xa8   :  { %2628 = vmatmul.msk.f32.gmra.mxu2 %vm110_vm1, %v344_v60 }
  0xa9   :  { %1316 = vmatpush.msra.mxu2 %v207_v27  ;;  %v253_v6 = vadd.f32 %v245_v0, %v221_v1 }
  0xab   :  { %1317 = vmatpush.msra.mxu2 %v206_v57  ;;  %v240_v25 = vld [vmem:[#allocation2 + $0x32] sm:$0xff]  ;;  %v241_v32 = vld [vmem:[#allocation2 + $0x3a] sm:$0xff] }
  0xac   :  { %2619 = vmatmul.msk.f32.gmra.mxu1 %vm110_vm1, %v260_v63  ;;  %v348_v27 = vsub.f32 %v240_v25, %v224_v24  ;;  %v233_v28 = vld [vmem:[#allocation2 + $0x39] sm:$0xff] }
  0xad   :  { %1318 = vmatpush.msra.mxu2 %v205_v44  ;;  %v237_v2 = vld [vmem:[#allocation2 + $0x1a] sm:$0xff]  ;;  %v238_v10 = vld [vmem:[#allocation2 + $0x22] sm:$0xff]  ;;  %v249_v30 = vmul.f32 2.0, %v233_v28 }
  0xae   :  { %v345_v3 = vsub.f32 %v237_v2, %v221_v1  ;;  %v230_v5 = vld [vmem:[#allocation2 + $0x21] sm:$0xff]  ;;  %v261_v7 = vadd.f32 %v253_v6, %v237_v2  ;;  %v225_v31 = vld [vmem:[#allocation2 + $0x38] sm:$0xff] }
  0xaf   :  { %1319 = vmatpush.msra.mxu2 %v204_v29  ;;  %v246_v8 = vmul.f32 2.0, %v230_v5  ;;  %v222_v9 = vld [vmem:[#allocation2 + $0x20] sm:$0xff]  ;;  %v223_v16 = vld [vmem:[#allocation2 + $0x28] sm:$0xff]  ;;  %v257_v33 = vadd.f32 %v249_v30, %v225_v31  ;;  %v349_v34 = vsub.f32 %v241_v32, %v225_v31 }
  0xb0   :  { %2629 = vmatmul.msk.f32.gmra.mxu2 %vm110_vm1, %v345_v3  ;;  %v346_v12 = vsub.f32 %v238_v10, %v222_v9  ;;  %v255_v20 = vadd.f32 %v247_v15, %v223_v16  ;;  %v347_v21 = vsub.f32 %v239_v18, %v223_v16 }
  0xb1   :  { %1320 = vmatpush.msra.mxu2 %v203_v23  ;;  %v254_v11 = vadd.f32 %v246_v8, %v222_v9  ;;  %v232_v23 = vld [vmem:[#allocation2 + $0x31] sm:$0xff]  ;;  %v265_v35 = vadd.f32 %v257_v33, %v241_v32 }
  0xb2   :  { %v263_v19 = vadd.f32 %v255_v20, %v239_v18 }
  0xb3   :  { %1321 = vmatpush.msra.mxu2 %v202_v22  ;;  %v262_v14 = vadd.f32 %v254_v11, %v238_v10  ;;  %v248_v22 = vmul.f32 2.0, %v232_v23 }
  0xb4   :  { %2620 = vmatmul.msk.f32.gmra.mxu1 %vm110_vm1, %v261_v7 }
  0xb5   :  { %v256_v26 = vadd.f32 %v248_v22, %v224_v24 }
  0xb7   :  { %v264_v29 = vadd.f32 %v256_v26, %v240_v25 }
  0xb8   :  { %2630 = vmatmul.msk.f32.gmra.mxu2 %vm110_vm1, %v346_v12 }
  0xbc   :  { %2621 = vmatmul.msk.f32.gmra.mxu1 %vm110_vm1, %v262_v14 }
  0xc0   :  { %2631 = vmatmul.msk.f32.gmra.mxu2 %vm110_vm1, %v347_v21 }
  0xc4   :  { %2622 = vmatmul.msk.f32.gmra.mxu1 %vm110_vm1, %v263_v19 }
  0xc8   :  { %2632 = vmatmul.msk.f32.gmra.mxu2 %vm110_vm1, %v348_v27 }
  0xcc   :  { %2623 = vmatmul.msk.f32.gmra.mxu1 %vm110_vm1, %v264_v29 }
  0xd0   :  { %2633 = vmatmul.msk.f32.gmra.mxu2 %vm110_vm1, %v349_v34 }
  0xd4   :  { %2624 = vmatmul.msk.f32.gmra.mxu1 %vm110_vm1, %v265_v35 }
  0xdc   :  { %2659 = vmatmul.msk.f32.vlgmr.msra.gmra.mxu1 %vm132_vm2, %v2650_v36 }
  0xe4   :  { %2660 = vmatmul.msk.f32.gmra.mxu1 %vm132_vm2, %v2651_v37 }
  0xec   :  { %2661 = vmatmul.msk.f32.gmra.mxu1 %vm132_vm2, %v2652_v38 }
  0xf4   :  { %2662 = vmatmul.msk.f32.gmra.mxu1 %vm132_vm2, %v2653_v39 }
  0xfc   :  { %2663 = vmatmul.msk.f32.gmra.mxu1 %vm132_vm2, %v2654_v40 }
 0x104   :  { %2664 = vmatmul.msk.f32.gmra.mxu1 %vm132_vm2, %v2655_v41 }
 0x10c   :  { %2665 = vmatmul.msk.f32.gmra.mxu1 %vm132_vm2, %v2656_v42 }
 0x114   :  { %2666 = vmatmul.msk.f32.gmra.mxu1 %vm132_vm2, %v2657_v43 }
 0x116   :  { %v394_v20 = vpop.f32.mrf.mxu0 }
 0x117   :  { %v418_v22 = vand.u32 2147483647, %v394_v20 }
 0x119   :  { %v3228_v44 = vpop.f32.mrf.mxu1 }
 0x11a   :  { %v334_v27 = vand.u32 2147483647, %v3228_v44 }
 0x121   :  { %v3230_v45 = vpop.f32.mrf.mxu1 }
 0x122   :  { %v335_v38 = vand.u32 2147483647, %v3230_v45 }
 0x123   :  { %v397_v46 = vpop.f32.mrf.mxu2 }
 0x124   :  { %v419_v15 = vand.u32 2147483647, %v397_v46 }
 0x129   :  { %v3232_v47 = vpop.f32.mrf.mxu1 }
 0x12b   :  { %v400_v48 = vpop.f32.mrf.mxu2 }
 0x12c   :  { %v420_v9 = vand.u32 2147483647, %v400_v48 }
 0x131   :  { %v3234_v49 = vpop.f32.mrf.mxu1 }
 0x133   :  { %v403_v50 = vpop.f32.mrf.mxu2 }
 0x134   :  { %v421_v6 = vand.u32 2147483647, %v403_v50 }
 0x139   :  { %v3236_v51 = vpop.f32.mrf.mxu1 }
 0x13a   :  { %v338_v20 = vand.u32 2147483647, %v3236_v51 }
 0x13b   :  { %v406_v52 = vpop.f32.mrf.mxu2 }
 0x13c   :  { %v422_v1 = vand.u32 2147483647, %v406_v52  ;;  %v336_v52 = vand.u32 2147483647, %v3232_v47 }
 0x141   :  { %v3238_v53 = vpop.f32.mrf.mxu1 }
 0x142   :  { %v339_v51 = vand.u32 2147483647, %v3238_v53 }
 0x143   :  { %v409_v54 = vpop.f32.mrf.mxu2 }
 0x144   :  { %v423_v0 = vand.u32 2147483647, %v409_v54 }
 0x149   :  { %v3240_v55 = vpop.f32.mrf.mxu1 }
 0x14b   :  { %v412_v56 = vpop.f32.mrf.mxu2 }
 0x14c   :  { %v424_v60 = vand.u32 2147483647, %v412_v56 }
 0x151   :  { %v3242_v57 = vpop.f32.mrf.mxu1 }
 0x153   :  { %v415_v58 = vpop.f32.mrf.mxu2 }
 0x154   :  { %v425_v59 = vand.u32 2147483647, %v415_v58 }
 0x156   :  { %2634 = vmatpush.xpose.msk.msrb.mxu3 %vm110_vm1, %v425_v59 }
 0x159   :  { %v565_v61 = vpop.f32.mrf.mxu1 }
 0x15a   :  { %v3246_v62 = vadd.f32 %v565_v61, %v3148_v17  ;;  %2635 = vmatpush.xpose.msk.msrb.mxu3 %vm110_vm1, %v424_v60 }
 0x15c   :  { %4699 = vst [vmem:[#allocation3_spill] sm:$0xff] %v3246_v62  ;;  %v4682_v63 = vmax.f32 %v3246_v62, 0.0 }
 0x15e   :  { %597 = vst.msk [vmem:[#allocation2 + $0x1] sm:$0xff] %vm110_vm1, %v4682_v63  ;;  %2636 = vmatpush.xpose.msk.msrb.mxu3 %vm110_vm1, %v423_v0 }
 0x161   :  { %v568_v2 = vpop.f32.mrf.mxu1 }
 0x162   :  { %v3255_v3 = vadd.f32 %v568_v2, %v3148_v17  ;;  %2637 = vmatpush.xpose.msk.msrb.mxu3 %vm110_vm1, %v422_v1 }
 0x164   :  { %4700 = vst [vmem:[#allocation4_spill] sm:$0xff] %v3255_v3  ;;  %v4683_v5 = vmax.f32 %v3255_v3, 0.0 }
 0x165   :  { %v613_v7 = vld [vmem:[#allocation2 + $0x1] sm:$0xff] }
 0x166   :  { %598 = vst.msk [vmem:[#allocation2 + $0x9] sm:$0xff] %vm110_vm1, %v4683_v5  ;;  %2638 = vmatpush.xpose.msk.msrb.mxu3 %vm110_vm1, %v421_v6  ;;  %v629_v8 = vmul.f32 2.0, %v613_v7  ;;  %v605_v12 = vld [vmem:[#allocation2] sm:$0xff]  ;;  %v337_v6 = vand.u32 2147483647, %v3234_v49 }
 0x168   :  { %v637_v14 = vadd.f32 %v629_v8, %v605_v12 }
 0x169   :  { %v571_v10 = vpop.f32.mrf.mxu1 }
 0x16a   :  { %v3264_v11 = vadd.f32 %v571_v10, %v3148_v17  ;;  %2639 = vmatpush.xpose.msk.msrb.mxu3 %vm110_vm1, %v420_v9 }
 0x16c   :  { %4701 = vst [vmem:[#allocation5_spill] sm:$0xff] %v3264_v11  ;;  %v4684_v13 = vmax.f32 %v3264_v11, 0.0 }
 0x16d   :  { %v621_v16 = vld [vmem:[#allocation2 + $0x2] sm:$0xff] }
 0x16e   :  { %v614_v18 = vld [vmem:[#allocation2 + $0x9] sm:$0xff]  ;;  %599 = vst.msk [vmem:[#allocation2 + $0x11] sm:$0xff] %vm110_vm1, %v4684_v13  ;;  %v645_v21 = vadd.f32 %v637_v14, %v621_v16  ;;  %v726_v23 = vsub.f32 %v621_v16, %v605_v12  ;;  %2640 = vmatpush.xpose.msk.msrb.mxu3 %vm110_vm1, %v419_v15 }
 0x16f   :  { %v630_v19 = vmul.f32 2.0, %v614_v18  ;;  %v606_v26 = vld [vmem:[#allocation2 + $0x8] sm:$0xff] }
 0x170   :  { %2668 = vmatmul.msk.f32.vlgmr.msrb.gmra.mxu2 %vm110_vm1, %v645_v21  ;;  %2677 = vmatmul.msk.f32.vlgmr.msra.gmra.mxu0 %vm110_vm1, %v726_v23 }
 0x171   :  { %v574_v24 = vpop.f32.mrf.mxu1  ;;  %v638_v29 = vadd.f32 %v630_v19, %v606_v26 }
 0x172   :  { %v3275_v25 = vadd.f32 %v574_v24, %v3148_v17  ;;  %2641 = vmatpush.xpose.msk.msrb.mxu3 %vm110_vm1, %v418_v22 }
 0x174   :  { %4702 = vst [vmem:[#allocation6_spill] sm:$0xff] %v3275_v25  ;;  %v4685_v28 = vmax.f32 %v3275_v25, 0.0 }
 0x175   :  { %v622_v30 = vld [vmem:[#allocation2 + $0xa] sm:$0xff]  ;;  %2642 = vmatmul.msk.f32.vlgmr.msrb.gmra.mxu3 %vm110_vm1, %v334_v27 }
 0x176   :  { %v615_v31 = vld [vmem:[#allocation2 + $0x11] sm:$0xff]  ;;  %600 = vst.msk [vmem:[#allocation2 + $0x19] sm:$0xff] %vm110_vm1, %v4685_v28  ;;  %v646_v32 = vadd.f32 %v638_v29, %v622_v30  ;;  %v727_v33 = vsub.f32 %v622_v30, %v606_v26 }
 0x177   :  { %v631_v34 = vmul.f32 2.0, %v615_v31  ;;  %v607_v37 = vld [vmem:[#allocation2 + $0x10] sm:$0xff] }
 0x178   :  { %2669 = vmatmul.msk.f32.gmra.mxu2 %vm110_vm1, %v646_v32  ;;  %2678 = vmatmul.msk.f32.gmra.mxu0 %vm110_vm1, %v727_v33 }
 0x179   :  { %v577_v35 = vpop.f32.mrf.mxu1  ;;  %v639_v40 = vadd.f32 %v631_v34, %v607_v37 }
 0x17a   :  { %v3287_v36 = vadd.f32 %v577_v35, %v3148_v17 }
 0x17c   :  { %4703 = vst [vmem:[#allocation7_spill] sm:$0xff] %v3287_v36  ;;  %v4686_v39 = vmax.f32 %v3287_v36, 0.0 }
 0x17d   :  { %v623_v41 = vld [vmem:[#allocation2 + $0x12] sm:$0xff]  ;;  %2643 = vmatmul.msk.f32.gmra.mxu3 %vm110_vm1, %v335_v38 }
 0x17e   :  { %v616_v42 = vld [vmem:[#allocation2 + $0x19] sm:$0xff]  ;;  %601 = vst.msk [vmem:[#allocation2 + $0x21] sm:$0xff] %vm110_vm1, %v4686_v39  ;;  %v647_v43 = vadd.f32 %v639_v40, %v623_v41  ;;  %v728_v44 = vsub.f32 %v623_v41, %v607_v37  ;;  %v340_v40 = vand.u32 2147483647, %v3240_v55 }
 0x17f   :  { %v632_v46 = vmul.f32 2.0, %v616_v42  ;;  %v608_v50 = vld [vmem:[#allocation2 + $0x18] sm:$0xff]  ;;  %v341_v42 = vand.u32 2147483647, %v3242_v57 }
 0x180   :  { %2670 = vmatmul.msk.f32.gmra.mxu2 %vm110_vm1, %v647_v43  ;;  %2679 = vmatmul.msk.f32.gmra.mxu0 %vm110_vm1, %v728_v44 }
 0x181   :  { %v580_v48 = vpop.f32.mrf.mxu1  ;;  %v640_v56 = vadd.f32 %v632_v46, %v608_v50 }
 0x182   :  { %v3298_v45 = vadd.f32 %v580_v48, %v3148_v17 }
 0x184   :  { %4704 = vst [vmem:[#allocation8_spill] sm:$0xff] %v3298_v45  ;;  %v4687_v54 = vmax.f32 %v3298_v45, 0.0 }
 0x185   :  { %v624_v58 = vld [vmem:[#allocation2 + $0x1a] sm:$0xff]  ;;  %2644 = vmatmul.msk.f32.gmra.mxu3 %vm110_vm1, %v336_v52 }
 0x186   :  { %v617_v59 = vld [vmem:[#allocation2 + $0x21] sm:$0xff]  ;;  %602 = vst.msk [vmem:[#allocation2 + $0x29] sm:$0xff] %vm110_vm1, %v4687_v54  ;;  %v648_v60 = vadd.f32 %v640_v56, %v624_v58  ;;  %v729_v61 = vsub.f32 %v624_v58, %v608_v50 }
 0x187   :  { %v633_v0 = vmul.f32 2.0, %v617_v59  ;;  %v609_v2 = vld [vmem:[#allocation2 + $0x20] sm:$0xff] }
 0x188   :  { %2671 = vmatmul.msk.f32.gmra.mxu2 %vm110_vm1, %v648_v60  ;;  %2680 = vmatmul.msk.f32.gmra.mxu0 %vm110_vm1, %v729_v61 }
 0x189   :  { %v583_v1 = vpop.f32.mrf.mxu1  ;;  %v641_v8 = vadd.f32 %v633_v0, %v609_v2 }
 0x18a   :  { %v3309_v47 = vadd.f32 %v583_v1, %v3148_v17 }
 0x18c   :  { %4705 = vst [vmem:[#allocation9_spill] sm:$0xff] %v3309_v47  ;;  %v4688_v7 = vmax.f32 %v3309_v47, 0.0 }
 0x18d   :  { %v625_v9 = vld [vmem:[#allocation2 + $0x22] sm:$0xff]  ;;  %2645 = vmatmul.msk.f32.gmra.mxu3 %vm110_vm1, %v337_v6 }
 0x18e   :  { %v618_v10 = vld [vmem:[#allocation2 + $0x29] sm:$0xff]  ;;  %603 = vst.msk [vmem:[#allocation2 + $0x31] sm:$0xff] %vm110_vm1, %v4688_v7  ;;  %v649_v12 = vadd.f32 %v641_v8, %v625_v9  ;;  %v730_v14 = vsub.f32 %v625_v9, %v609_v2 }
 0x18f   :  { %v634_v15 = vmul.f32 2.0, %v618_v10  ;;  %v610_v18 = vld [vmem:[#allocation2 + $0x28] sm:$0xff] }
 0x190   :  { %2672 = vmatmul.msk.f32.gmra.mxu2 %vm110_vm1, %v649_v12  ;;  %2681 = vmatmul.msk.f32.gmra.mxu0 %vm110_vm1, %v730_v14 }
 0x191   :  { %v586_v16 = vpop.f32.mrf.mxu1  ;;  %v642_v23 = vadd.f32 %v634_v15, %v610_v18 }
 0x192   :  { %v3320_v49 = vadd.f32 %v586_v16, %v3148_v17 }
 0x194   :  { %4706 = vst [vmem:[#allocation10_spill] sm:$0xff] %v3320_v49  ;;  %v4689_v21 = vmax.f32 %v3320_v49, 0.0 }
 0x195   :  { %v626_v19 = vld [vmem:[#allocation2 + $0x2a] sm:$0xff]  ;;  %2646 = vmatmul.msk.f32.gmra.mxu3 %vm110_vm1, %v338_v20 }
 0x196   :  { %v619_v22 = vld [vmem:[#allocation2 + $0x31] sm:$0xff]  ;;  %604 = vst.msk [vmem:[#allocation2 + $0x39] sm:$0xff] %vm110_vm1, %v4689_v21  ;;  %v650_v24 = vadd.f32 %v642_v23, %v626_v19  ;;  %v731_v26 = vsub.f32 %v626_v19, %v610_v18 }
 0x197   :  { %v635_v17 = vmul.f32 2.0, %v619_v22  ;;  %v611_v27 = vld [vmem:[#allocation2 + $0x30] sm:$0xff] }
 0x198   :  { %2673 = vmatmul.msk.f32.gmra.mxu2 %vm110_vm1, %v650_v24  ;;  %2682 = vmatmul.msk.f32.gmra.mxu0 %vm110_vm1, %v731_v26 }
 0x199   :  { %v643_v29 = vadd.f32 %v635_v17, %v611_v27 }
 0x19d   :  { %v627_v30 = vld [vmem:[#allocation2 + $0x32] sm:$0xff]  ;;  %2647 = vmatmul.msk.f32.gmra.mxu3 %vm110_vm1, %v339_v51  ;;  %v628_v38 = vld [vmem:[#allocation2 + $0x3a] sm:$0xff] }
 0x19e   :  { %v620_v31 = vld [vmem:[#allocation2 + $0x39] sm:$0xff]  ;;  %v651_v32 = vadd.f32 %v643_v29, %v627_v30  ;;  %v732_v33 = vsub.f32 %v627_v30, %v611_v27 }
 0x19f   :  { %v636_v34 = vmul.f32 2.0, %v620_v31  ;;  %v612_v35 = vld [vmem:[#allocation2 + $0x38] sm:$0xff] }
 0x1a0   :  { %2674 = vmatmul.msk.f32.gmra.mxu2 %vm110_vm1, %v651_v32  ;;  %2683 = vmatmul.msk.f32.gmra.mxu0 %vm110_vm1, %v732_v33  ;;  %v733_v41 = vsub.f32 %v628_v38, %v612_v35 }
 0x1a1   :  { %v644_v37 = vadd.f32 %v636_v34, %v612_v35 }
 0x1a3   :  { %v652_v53 = vadd.f32 %v644_v37, %v628_v38 }
 0x1a5   :  { %2648 = vmatmul.msk.f32.gmra.mxu3 %vm110_vm1, %v340_v40 }
 0x1a8   :  { %2675 = vmatmul.msk.f32.gmra.mxu2 %vm110_vm1, %v652_v53  ;;  %2684 = vmatmul.msk.f32.gmra.mxu0 %vm110_vm1, %v733_v41 }
 0x1ad   :  { %2649 = vmatmul.msk.f32.gmra.mxu3 %vm110_vm1, %v341_v42 }
 0x1ed   :  { %v775_v43 = vpop.f32.mrf.mxu0 }
 0x1ee   :  { %v799_v8 = vand.u32 2147483647, %v775_v43 }
 0x1f3   :  { %v694_v61 = vpop.f32.mrf.mxu2 }
 0x1f4   :  { %v718_v9 = vand.u32 2147483647, %v694_v61 }
 0x1f5   :  { %v778_v44 = vpop.f32.mrf.mxu0 }
 0x1f6   :  { %v800_v2 = vand.u32 2147483647, %v778_v44 }
 0x1f8   :  { %v491_v17 = vpop.f32.mrf.mxu3 }
 0x1fb   :  { %v697_v6 = vpop.f32.mrf.mxu2 }
 0x1fc   :  { %v719_v12 = vand.u32 2147483647, %v697_v6 }
 0x1fd   :  { %v781_v46 = vpop.f32.mrf.mxu0 }
 0x1fe   :  { %v801_v1 = vand.u32 2147483647, %v781_v46 }
 0x200   :  { %v494_v51 = vpop.f32.mrf.mxu3 }
 0x203   :  { %v700_v10 = vpop.f32.mrf.mxu2 }
 0x204   :  { %v720_v15 = vand.u32 2147483647, %v700_v10 }
 0x205   :  { %v784_v48 = vpop.f32.mrf.mxu0 }
 0x206   :  { %v802_v0 = vand.u32 2147483647, %v784_v48 }
 0x208   :  { %v497_v29 = vpop.f32.mrf.mxu3 }
 0x20b   :  { %v703_v14 = vpop.f32.mrf.mxu2 }
 0x20c   :  { %v721_v18 = vand.u32 2147483647, %v703_v14 }
 0x20d   :  { %v787_v50 = vpop.f32.mrf.mxu0 }
 0x20e   :  { %v803_v57 = vand.u32 2147483647, %v787_v50 }
 0x210   :  { %v500_v30 = vpop.f32.mrf.mxu3 }
 0x213   :  { %v706_v16 = vpop.f32.mrf.mxu2 }
 0x214   :  { %v722_v20 = vand.u32 2147483647, %v706_v16 }
 0x215   :  { %v790_v52 = vpop.f32.mrf.mxu0 }
 0x216   :  { %v804_v60 = vand.u32 2147483647, %v790_v52 }
 0x218   :  { %v503_v31 = vpop.f32.mrf.mxu3 }
 0x21b   :  { %v709_v23 = vpop.f32.mrf.mxu2 }
 0x21c   :  { %v723_v19 = vand.u32 2147483647, %v709_v23 }
 0x21d   :  { %v793_v56 = vpop.f32.mrf.mxu0 }
 0x21e   :  { %v805_v59 = vand.u32 2147483647, %v793_v56 }
 0x220   :  { %v506_v32 = vpop.f32.mrf.mxu3 }
 0x223   :  { %v712_v22 = vpop.f32.mrf.mxu2 }
 0x224   :  { %v724_v24 = vand.u32 2147483647, %v712_v22 }
 0x225   :  { %v796_v55 = vpop.f32.mrf.mxu0 }
 0x226   :  { %v806_v58 = vand.u32 2147483647, %v796_v55 }
 0x228   :  { %2685 = vmatpush.xpose.msk.msra.mxu3 %vm110_vm1, %v806_v58  ;;  %v3356_v33 = vpop.f32.mrf.mxu3 }
 0x22b   :  { %v715_v26 = vpop.f32.mrf.mxu2 }
 0x22c   :  { %2686 = vmatpush.xpose.msk.msra.mxu3 %vm110_vm1, %v805_v59  ;;  %v725_v27 = vand.u32 2147483647, %v715_v26 }
 0x230   :  { %2687 = vmatpush.xpose.msk.msra.mxu3 %vm110_vm1, %v804_v60  ;;  %v3358_v34 = vpop.f32.mrf.mxu3 }
 0x234   :  { %2688 = vmatpush.xpose.msk.msra.mxu3 %vm110_vm1, %v803_v57 }
 0x238   :  { %2689 = vmatpush.xpose.msk.msra.mxu3 %vm110_vm1, %v802_v0 }
 0x23c   :  { %2690 = vmatpush.xpose.msk.msra.mxu3 %vm110_vm1, %v801_v1 }
 0x240   :  { %2691 = vmatpush.xpose.msk.msra.mxu3 %vm110_vm1, %v800_v2 }
 0x244   :  { %2692 = vmatpush.xpose.msk.msra.mxu3 %vm110_vm1, %v799_v8 }
 0x247   :  { %2693 = vmatmul.msk.f32.vlgmr.msra.gmra.mxu3 %vm110_vm1, %v718_v9 }
 0x24f   :  { %2694 = vmatmul.msk.f32.gmra.mxu3 %vm110_vm1, %v719_v12 }
 0x257   :  { %2695 = vmatmul.msk.f32.gmra.mxu3 %vm110_vm1, %v720_v15 }
 0x25f   :  { %2696 = vmatmul.msk.f32.gmra.mxu3 %vm110_vm1, %v721_v18 }
 0x267   :  { %2697 = vmatmul.msk.f32.gmra.mxu3 %vm110_vm1, %v722_v20 }
 0x26f   :  { %2698 = vmatmul.msk.f32.gmra.mxu3 %vm110_vm1, %v723_v19 }
 0x277   :  { %2699 = vmatmul.msk.f32.gmra.mxu3 %vm110_vm1, %v724_v24  ;;  %v75_v24 = vlaneseq }
 0x27f   :  { %2700 = vmatmul.msk.f32.gmra.mxu3 %vm110_vm1, %v725_v27 }
 0x2ca   :  { %v872_v35 = vpop.f32.mrf.mxu3 }
 0x2cb   :  { %v896_v44 = vmax.f32 %v491_v17, %v872_v35 }
 0x2cd   :  { %v904_v56 = vsub.f32 %v491_v17, %v896_v44  ;;  %v928_v58 = vsub.f32 %v872_v35, %v896_v44 }
 0x2cf   :  { %v912_v0 = vmul.f32 1.442695, %v904_v56  ;;  %v936_v2 = vmul.f32 1.442695, %v928_v58 }
 0x2d2   :  { %v875_v37 = vpop.f32.mrf.mxu3 }
 0x2d3   :  { %v897_v6 = vmax.f32 %v494_v51, %v875_v37 }
 0x2d5   :  { %v905_v14 = vsub.f32 %v494_v51, %v897_v6  ;;  %v929_v20 = vsub.f32 %v875_v37, %v897_v6  ;;  %v3386_v37 = vshrl.u32 %v75_v24, 7 }
 0x2d7   :  { %v914_v17 = vmul.f32 1.442695, %v905_v14  ;;  %v79_v44 = vadd.s32 24, %v3386_v37 }
 0x2da   :  { %v878_v38 = vpop.f32.mrf.mxu3 }
 0x2db   :  { %v898_v40 = vmax.f32 %v497_v29, %v878_v38 }
 0x2dd   :  { %v906_v53 = vsub.f32 %v497_v29, %v898_v40  ;;  %v930_v41 = vsub.f32 %v878_v38, %v898_v40  ;;  %v938_v29 = vmul.f32 1.442695, %v929_v20 }
 0x2df   :  { %v916_v42 = vmul.f32 1.442695, %v906_v53  ;;  %v940_v43 = vmul.f32 1.442695, %v930_v41 }
 0x2e1   :  { %2935 = vpow2.f32 %v916_v42 }
 0x2e2   :  { %2937 = vpow2.f32 %v940_v43  ;;  %v881_v46 = vpop.f32.mrf.mxu3 }
 0x2e3   :  { %v899_v48 = vmax.f32 %v500_v30, %v881_v46 }
 0x2e5   :  { %v907_v50 = vsub.f32 %v500_v30, %v899_v48  ;;  %v931_v52 = vsub.f32 %v881_v46, %v899_v48 }
 0x2e7   :  { %v3360_v55 = vpop.eup %2935  ;;  %v918_v59 = vmul.f32 1.442695, %v907_v50  ;;  %v942_v60 = vmul.f32 1.442695, %v931_v52  ;;  %v3401_v50 = vand.u32 127, %v75_v24 }
 0x2e8   :  { %v3362_v57 = vpop.eup %2937 }
 0x2e9   :  { %v3366_v61 = vadd.f32 %v3362_v57, %v3360_v55  ;;  %2939 = vpow2.f32 %v918_v59  ;;  %vm89_vm4 = vcmp.eq.s32.totalorder %v79_v44, %v3401_v50 }
 0x2ea   :  { %2941 = vpow2.f32 %v942_v60  ;;  %v884_v1 = vpop.f32.mrf.mxu3  ;;  %v3428_v24 = vsel %vm89_vm4, 1.0, %v3015_v4 }
 0x2eb   :  { %2943 = vrcp.f32 %v3366_v61  ;;  %v900_v8 = vmax.f32 %v503_v31, %v884_v1  ;;  %vm995_vm7 = vweird.f32 %v3366_v61 }
 0x2ec   :  { %2945 = vpow2.f32 %v912_v0 }
 0x2ed   :  { %v908_v9 = vsub.f32 %v503_v31, %v900_v8  ;;  %v932_v10 = vsub.f32 %v884_v1, %v900_v8  ;;  %2947 = vpow2.f32 %v936_v2 }
 0x2ef   :  { %v3369_v12 = vpop.eup %2939  ;;  %v920_v15 = vmul.f32 1.442695, %v908_v9  ;;  %v944_v16 = vmul.f32 1.442695, %v932_v10  ;;  %v78_v10 = vadd.s32 16, %v3386_v37 }
 0x2f0   :  { %v3371_v18 = vpop.eup %2941 }
 0x2f1   :  { %v3373_v23 = vpop.eup %2943  ;;  %v3377_v19 = vadd.f32 %v3371_v18, %v3369_v12  ;;  %2949 = vpow2.f32 %v920_v15  ;;  %vm88_vm13 = vcmp.eq.s32.totalorder %v78_v10, %v3401_v50 }
 0x2f2   :  { %2951 = vpow2.f32 %v944_v16  ;;  %v887_v22 = vpop.f32.mrf.mxu3  ;;  %v991_v26 = vmul.f32 %v3373_v23, %v3366_v61  ;;  %v3382_v51 = vpop.eup %2945  ;;  %vm996_vm5 = vweird.f32 %v3373_v23 }
 0x2f3   :  { %2953 = vrcp.f32 %v3377_v19  ;;  %v901_v27 = vmax.f32 %v506_v32, %v887_v22  ;;  %v3384_v30 = vpop.eup %2947  ;;  %v1014_v2 = vand.u32 2147483647, %v3377_v19  ;;  %v1016_v6 = vand.u32 2147483648, %v3377_v19  ;;  %vm3433_vm9 = vmor %vm995_vm7, %vm996_vm5 }
 0x2f4   :  { %v992_v38 = vsub.f32 1.0, %v991_v26  ;;  %2955 = vpow2.f32 %v914_v17  ;;  %v3394_v43 = vadd.f32 %v3384_v30, %v3382_v51  ;;  %vm1010_vm8 = vweird.f32 %v3377_v19 }
 0x2f5   :  { %v909_v31 = vsub.f32 %v506_v32, %v901_v27  ;;  %v933_v35 = vsub.f32 %v887_v22, %v901_v27  ;;  %2957 = vpow2.f32 %v938_v29  ;;  %v999_v27 = vand.u32 2147483647, %v3366_v61 }
 0x2f6   :  { %v993_v56 = vmul.f32 %v3373_v23, %v992_v38  ;;  %vm1015_vm11 = vcmp.eq.f32.partialorder %v1014_v2, 8.507059e+37 }
 0x2f7   :  { %v3388_v40 = vpop.eup %2949  ;;  %v922_v53 = vmul.f32 1.442695, %v909_v31  ;;  %v946_v41 = vmul.f32 1.442695, %v933_v35  ;;  %v1017_v35 = vor.u32 1.1754944e-38, %v1016_v6  ;;  %vm1000_vm12 = vcmp.eq.f32.partialorder %v999_v27, 8.507059e+37 }
 0x2f8   :  { %v3390_v42 = vpop.eup %2951  ;;  %v994_v14 = vadd.f32 %v3373_v23, %v993_v56 }
 0x2f9   :  { %v2954_v46 = vpop.eup %2953  ;;  %v3399_v32 = vadd.f32 %v3390_v42, %v3388_v40  ;;  %2959 = vpow2.f32 %v922_v53 }
 0x2fa   :  { %2961 = vpow2.f32 %v946_v41  ;;  %v890_v48 = vpop.f32.mrf.mxu3  ;;  %v1006_v52 = vmul.f32 %v2954_v46, %v3377_v19  ;;  %v3410_v60 = vpop.eup %2955  ;;  %vm1011_vm6 = vweird.f32 %v2954_v46 }
 0x2fb   :  { %2963 = vrcp.f32 %v3399_v32  ;;  %v902_v58 = vmax.f32 %v3356_v33, %v890_v48  ;;  %v3415_v8 = vpop.eup %2957  ;;  %vm1012_vm10 = vmor %vm1010_vm8, %vm1011_vm6  ;;  %vm1025_vm4 = vweird.f32 %v3399_v32 }
 0x2fc   :  { %2965 = vrcp.f32 %v3394_v43  ;;  %v1007_v59 = vsub.f32 1.0, %v1006_v52  ;;  %v3477_v10 = vadd.f32 %v3415_v8, %v3410_v60 }
 0x2fd   :  { %v910_v0 = vsub.f32 %v3356_v33, %v902_v58  ;;  %v934_v1 = vsub.f32 %v890_v48, %v902_v58  ;;  %v1001_v33 = vand.u32 2147483648, %v3366_v61  ;;  %v998_v61 = vsel %vm3433_vm9, %v3373_v23, %v994_v14 }
 0x2fe   :  { %v1008_v9 = vmul.f32 %v2954_v46, %v1007_v59 }
 0x2ff   :  { %v3419_v15 = vpop.eup %2959  ;;  %v924_v16 = vmul.f32 1.442695, %v910_v0  ;;  %v948_v20 = vmul.f32 1.442695, %v934_v1  ;;  %v1002_v52 = vor.u32 1.1754944e-38, %v1001_v33  ;;  %v3484_v33 = vsel %vm88_vm13, 1.0, %v3015_v4 }
 0x300   :  { %v3423_v22 = vpop.eup %2961  ;;  %v1009_v26 = vadd.f32 %v2954_v46, %v1008_v9 }
 0x301   :  { %v3438_v29 = vpop.eup %2963  ;;  %v3442_v31 = vadd.f32 %v3423_v22, %v3419_v15  ;;  %2967 = vpow2.f32 %v924_v16 }
 0x302   :  { %v3445_v19 = vpop.eup %2965  ;;  %2969 = vpow2.f32 %v948_v20  ;;  %v893_v38 = vpop.f32.mrf.mxu3  ;;  %v1013_v53 = vsel %vm1012_vm10, %v2954_v46, %v1009_v26  ;;  %v1021_v41 = vmul.f32 %v3438_v29, %v3399_v32  ;;  %v3456_v46 = vsel %vm1000_vm12, %v1002_v52, %v998_v61 }
 0x303   :  { %2971 = vrcp.f32 %v3442_v31  ;;  %v903_v44 = vmax.f32 %v3358_v34, %v893_v38  ;;  %v1018_v48 = vsel %vm1015_vm11, %v1017_v35, %v1013_v53  ;;  %v1082_v14 = vmul.f32 %v3360_v55, %v3456_v46 }
 0x304   :  { %v1083_v56 = vmul.f32 %v3369_v12, %v1018_v48  ;;  %v3459_v0 = vmul.f32 %v3371_v18, %v1018_v48  ;;  %v1022_v1 = vsub.f32 1.0, %v1021_v41  ;;  %v81_v55 = vadd.s32 40, %v3386_v37 }
 0x305   :  { %v911_v58 = vsub.f32 %v3358_v34, %v903_v44  ;;  %v935_v59 = vsub.f32 %v893_v38, %v903_v44  ;;  %v961_v34 = vmul.f32 %v3445_v19, %v3394_v43  ;;  %v3491_v35 = vadd.f32 %v3484_v33, %v1082_v14 }
 0x306   :  { %v3462_v23 = vadd.f32 %v3428_v24, %v1083_v56  ;;  %v1023_v17 = vmul.f32 %v3438_v29, %v1022_v1  ;;  %v1046_v53 = vand.u32 2147483648, %v3442_v31  ;;  %vm1026_vm15 = vweird.f32 %v3438_v29 }
 0x307   :  { %v3465_v2 = vpop.eup %2967  ;;  %v926_v6 = vmul.f32 1.442695, %v911_v58  ;;  %v950_v9 = vmul.f32 1.442695, %v935_v59  ;;  %v962_v27 = vsub.f32 1.0, %v961_v34  ;;  %vm91_vm3 = vcmp.eq.s32.totalorder %v81_v55, %v3401_v50  ;;  %vm3509_vm6 = vmor %vm1025_vm4, %vm1026_vm15 }
 0x308   :  { %v3469_v12 = vpop.eup %2969  ;;  %v1106_v18 = vsel %vm1096_vm14, %v3462_v23, 0.0  ;;  %v1044_v41 = vand.u32 2147483647, %v3442_v31  ;;  %v1024_v44 = vadd.f32 %v3438_v29, %v1023_v17  ;;  %v1031_v52 = vand.u32 2147483648, %v3399_v32 }
 0x309   :  { %v2972_v16 = vpop.eup %2971  ;;  %v3481_v20 = vadd.f32 %v3469_v12, %v3465_v2  ;;  %2973 = vpow2.f32 %v926_v6  ;;  %1107 = vadd.xlane.f32.xlu2 %v1106_v18  ;;  %v963_v56 = vmul.f32 %v3445_v19, %v962_v27  ;;  %v1103_v59 = vsel %vm1096_vm14, %v3491_v35, 0.0 }
 0x30a   :  { %2975 = vpow2.f32 %v950_v9  ;;  %v1036_v26 = vmul.f32 %v2972_v16, %v3442_v31  ;;  %vm1041_vm2 = vweird.f32 %v2972_v16  ;;  %vm1040_vm5 = vweird.f32 %v3442_v31 }
 0x30b   :  { %2977 = vrcp.f32 %v3481_v20  ;;  %v1029_v9 = vand.u32 2147483647, %v3399_v32  ;;  %vm1042_vm7 = vmor %vm1040_vm5, %vm1041_vm2  ;;  %v1047_v14 = vor.u32 1.1754944e-38, %v1046_v53  ;;  %v3525_v31 = vsel %vm91_vm3, 1.0, %v3015_v4 }
 0x30c   :  { %v1037_v38 = vsub.f32 1.0, %v1036_v26  ;;  %2979 = vrcp.f32 %v3477_v10  ;;  %v80_v26 = vadd.s32 32, %v3386_v37  ;;  %vm1045_vm8 = vcmp.eq.f32.partialorder %v1044_v41, 8.507059e+37 }
 0x30d   :  { %v1028_v32 = vsel %vm3509_vm6, %v3438_v29, %v1024_v44  ;;  %v1032_v53 = vor.u32 1.1754944e-38, %v1031_v52  ;;  %vm1030_vm9 = vcmp.eq.f32.partialorder %v1029_v9, 8.507059e+37  ;;  %vm966_vm10 = vweird.f32 %v3445_v19 }
 0x30e   :  { %v1038_v61 = vmul.f32 %v2972_v16, %v1037_v38  ;;  %v971_v29 = vand.u32 2147483648, %v3394_v43  ;;  %vm90_vm11 = vcmp.eq.s32.totalorder %v80_v26, %v3401_v50  ;;  %vm965_vm12 = vweird.f32 %v3394_v43 }
 0x30f   :  { %v3498_v48 = vpop.eup %2973  ;;  %v3541_v41 = vsel %vm1030_vm9, %v1032_v53, %v1028_v32  ;;  %v969_v52 = vand.u32 2147483647, %v3394_v43  ;;  %vm967_vm13 = vmor %vm965_vm12, %vm966_vm10  ;;  %v3556_v9 = vsel %vm90_vm11, 1.0, %v3015_v4  ;;  %v83_v32 = vadd.s32 56, %v3386_v37 }
 0x310   :  { %v3504_v58 = vpop.eup %2975  ;;  %v1039_v1 = vadd.f32 %v2972_v16, %v1038_v61  ;;  %vm86_vm2 = vcmp.eq.s32.totalorder %v3386_v37, %v3401_v50  ;;  %vm980_vm12 = vweird.f32 %v3477_v10 }
 0x311   :  { %v3514_v34 = vpop.eup %2977  ;;  %v3518_v18 = vadd.f32 %v3504_v58, %v3498_v48  ;;  %1104 = vadd.xlane.f32.xlu2 %v1103_v59  ;;  %v1084_v59 = vmul.f32 %v3388_v40, %v3541_v41  ;;  %vm970_vm15 = vcmp.eq.f32.partialorder %v969_v52, 8.507059e+37  ;;  %vm93_vm4 = vcmp.eq.s32.totalorder %v83_v32, %v3401_v50 }
 0x312   :  { %v1043_v17 = vsel %vm1042_vm7, %v2972_v16, %v1039_v1  ;;  %v3530_v27 = vpop.eup %2979  ;;  %v1051_v61 = vmul.f32 %v3514_v34, %v3481_v20  ;;  %v964_v16 = vadd.f32 %v3445_v19, %v963_v56  ;;  %vm1056_vm5 = vweird.f32 %v3514_v34 }
 0x313   :  { %2981 = vrcp.f32 %v3518_v18  ;;  %v3533_v38 = vsel %vm1045_vm8, %v1047_v14, %v1043_v17  ;;  %v972_v14 = vor.u32 1.1754944e-38, %v971_v29  ;;  %v976_v26 = vmul.f32 %v3530_v27, %v3477_v10 }
 0x314   :  { %v1085_v55 = vmul.f32 %v3419_v15, %v3533_v38  ;;  %v1052_v15 = vsub.f32 1.0, %v1051_v61  ;;  %v968_v1 = vsel %vm967_vm13, %v3445_v19, %v964_v16  ;;  %v3566_v19 = vadd.f32 %v3556_v9, %v1084_v59 }
 0x315   :  { %v3561_v17 = vsel %vm970_vm15, %v972_v14, %v968_v1  ;;  %v1076_v61 = vand.u32 2147483648, %v3518_v18  ;;  %v1074_v52 = vand.u32 2147483647, %v3518_v18  ;;  %vm1070_vm6 = vweird.f32 %v3518_v18 }
 0x316   :  { %v3545_v44 = vadd.f32 %v3525_v31, %v1085_v55  ;;  %v1053_v40 = vmul.f32 %v3514_v34, %v1052_v15  ;;  %v977_v55 = vsub.f32 1.0, %v976_v26  ;;  %v1080_v16 = vmul.f32 %v3382_v51, %v3561_v17 }
 0x317   :  { %v1109_v59 = vsel %vm1096_vm14, %v3566_v19, 0.0  ;;  %v1061_v51 = vand.u32 2147483648, %v3481_v20  ;;  %v1077_v14 = vor.u32 1.1754944e-38, %v1076_v61  ;;  %vm1055_vm8 = vweird.f32 %v3481_v20 }
 0x318   :  { %v1112_v56 = vsel %vm1096_vm14, %v3545_v44, 0.0  ;;  %v1054_v15 = vadd.f32 %v3514_v34, %v1053_v40  ;;  %v1059_v26 = vand.u32 2147483647, %v3481_v20  ;;  %vm1075_vm9 = vcmp.eq.f32.partialorder %v1074_v52, 8.507059e+37  ;;  %vm1057_vm10 = vmor %vm1055_vm8, %vm1056_vm5 }
 0x319   :  { %v2982_v6 = vpop.eup %2981  ;;  %1113 = vadd.xlane.f32.xlu1 %v1112_v56  ;;  %v3575_v56 = vsel %vm86_vm2, 1.0, %v3015_v4  ;;  %v82_v61 = vadd.s32 48, %v3386_v37  ;;  %v1062_v63 = vor.u32 1.1754944e-38, %v1061_v51  ;;  %vm981_vm13 = vweird.f32 %v3530_v27 }
 0x31a   :  { %v1066_v43 = vmul.f32 %v2982_v6, %v3518_v18  ;;  %vm1071_vm3 = vweird.f32 %v2982_v6  ;;  %v3593_v18 = vsel %vm93_vm4, 1.0, %v3015_v4  ;;  %vm1060_vm11 = vcmp.eq.f32.partialorder %v1059_v26, 8.507059e+37  ;;  %vm982_vm2 = vmor %vm980_vm12, %vm981_vm13 }
 0x31b   :  { %vm1072_vm7 = vmor %vm1070_vm6, %vm1071_vm3  ;;  %vm92_vm15 = vcmp.eq.s32.totalorder %v82_v61, %v3401_v50  ;;  %v1894_v51 = vmul.f32 %v3390_v42, %v3541_v41 }
 0x31c   :  { %v1067_v53 = vsub.f32 1.0, %v1066_v43  ;;  %v3587_v43 = vadd.f32 %v3575_v56, %v1080_v16  ;;  %v3627_v26 = vsel %vm92_vm15, 1.0, %v3015_v4 }
 0x31d   :  { %v3635_v41 = vadd.f32 %v3556_v9, %v1894_v51 }
 0x31e   :  { %v1068_v29 = vmul.f32 %v2982_v6, %v1067_v53  ;;  %v978_v53 = vmul.f32 %v3530_v27, %v977_v55 }
 0x320   :  { %v1069_v1 = vadd.f32 %v2982_v6, %v1068_v29  ;;  %v979_v52 = vadd.f32 %v3530_v27, %v978_v53 }
 0x321   :  { %1110 = vadd.xlane.f32.xlu1 %v1109_v59  ;;  %v1058_v59 = vsel %vm1057_vm10, %v3514_v34, %v1054_v15  ;;  %v986_v34 = vand.u32 2147483648, %v3477_v10 }
 0x322   :  { %v1073_v40 = vsel %vm1072_vm7, %v2982_v6, %v1069_v1  ;;  %v1063_v55 = vsel %vm1060_vm11, %v1062_v63, %v1058_v59  ;;  %v1895_v63 = vmul.f32 %v3423_v22, %v3533_v38  ;;  %v983_v22 = vsel %vm982_vm2, %v3530_v27, %v979_v52 }
 0x323   :  { %v1078_v29 = vsel %vm1075_vm9, %v1077_v14, %v1073_v40  ;;  %v1086_v14 = vmul.f32 %v3465_v2, %v1063_v55  ;;  %v77_v40 = vadd.s32 8, %v3386_v37  ;;  %v987_v38 = vor.u32 1.1754944e-38, %v986_v34 }
 0x324   :  { %v1897_v20 = vmul.f32 %v3504_v58, %v1078_v29  ;;  %v1087_v16 = vmul.f32 %v3498_v48, %v1078_v29  ;;  %v1097_v58 = vsel %vm1096_vm14, %v3587_v43, 0.0  ;;  %v984_v48 = vand.u32 2147483647, %v3477_v10 }
 0x325   :  { %v3632_v42 = vadd.f32 %v3525_v31, %v1895_v63  ;;  %v3638_v2 = vadd.f32 %v3627_v26, %v1086_v14  ;;  %vm87_vm4 = vcmp.eq.s32.totalorder %v77_v40, %v3401_v50  ;;  %v1918_v37 = vsel %vm1096_vm14, %v3635_v41, 0.0 }
 0x326   :  { %v3602_v6 = vadd.f32 %v3593_v18, %v1897_v20  ;;  %v3605_v32 = vadd.f32 %v3593_v18, %v1087_v16  ;;  %vm985_vm3 = vcmp.eq.f32.partialorder %v984_v48, 8.507059e+37  ;;  %v1892_v27 = vmul.f32 %v3362_v57, %v3456_v46 }
 0x327   :  { %v988_v10 = vsel %vm985_vm3, %v987_v38, %v983_v22  ;;  %v1921_v53 = vsel %vm1096_vm14, %v3632_v42, 0.0  ;;  %v1115_v61 = vsel %vm1096_vm14, %v3638_v2, 0.0  ;;  %v3651_v59 = vsel %vm87_vm4, 1.0, %v3015_v4 }
 0x328   :  { %4711 = vst [vmem:[#allocation11_spill] sm:$0xff] %v3602_v6  ;;  %v1927_v15 = vsel %vm1096_vm14, %v3602_v6, 0.0  ;;  %v1118_v1 = vsel %vm1096_vm14, %v3605_v32, 0.0  ;;  %v1891_v29 = vmul.f32 %v3415_v8, %v988_v10  ;;  %v1081_v50 = vmul.f32 %v3410_v60, %v988_v10 }
 0x329   :  { %1098 = vadd.xlane.f32.xlu1 %v1097_v58  ;;  %1928 = vadd.xlane.f32.xlu2 %v1927_v15  ;;  %v3655_v20 = vadd.f32 %v3484_v33, %v1892_v27  ;;  %v1896_v60 = vmul.f32 %v3469_v12, %v1063_v55  ;;  %v3677_v48 = vadd.f32 %v3428_v24, %v3459_v0 }
 0x32a   :  { %1119 = vadd.xlane.f32.xlu0 %v1118_v1  ;;  %v3658_v16 = vadd.f32 %v3651_v59, %v1891_v29  ;;  %v3661_v57 = vadd.f32 %v3651_v59, %v1081_v50  ;;  %v1890_v15 = vmul.f32 %v3384_v30, %v3561_v17 }
 0x32b   :  { %v1912_v8 = vsel %vm1096_vm14, %v3655_v20, 0.0  ;;  %v3671_v52 = vadd.f32 %v3627_v26, %v1896_v60  ;;  %v1915_v34 = vsel %vm1096_vm14, %v3677_v48, 0.0 }
 0x32c   :  { %v1909_v46 = vsel %vm1096_vm14, %v3658_v16, 0.0  ;;  %v1100_v4 = vsel %vm1096_vm14, %v3661_v57, 0.0  ;;  %v3684_v12 = vadd.f32 %v3575_v56, %v1890_v15 }
 0x32d   :  { %v1924_v58 = vsel %vm1096_vm14, %v3671_v52, 0.0 }
 0x32e   :  { %v1906_v55 = vsel %vm1096_vm14, %v3684_v12, 0.0 }
 0x331   :  { %1922 = vadd.xlane.f32.xlu1 %v1921_v53  ;;  %1919 = vadd.xlane.f32.xlu2 %v1918_v37 }
 0x332   :  { %1116 = vadd.xlane.f32.xlu0 %v1115_v61 }
 0x339   :  { %1913 = vadd.xlane.f32.xlu1 %v1912_v8  ;;  %1910 = vadd.xlane.f32.xlu2 %v1909_v46 }
 0x33a   :  { %1101 = vadd.xlane.f32.xlu0 %v1100_v4 }
 0x342   :  { %1925 = vadd.xlane.f32.xlu0 %v1924_v58 }
 0x34a   :  { %1916 = vadd.xlane.f32.xlu0 %v1915_v34 }
 0x352   :  { %1907 = vadd.xlane.f32.xlu0 %v1906_v55 }
 0x37c   :  { %v3690_v63 = vpop.xlane.xlu2 %1107 }
 0x37d   :  { %2983 = vrsqrt.f32 %v3690_v63  ;;  %vm1157_vm8 = vweird.f32 %v3690_v63 }
 0x383   :  { %v3704_v40 = vpop.eup %2983 }
 0x384   :  { %v3694_v51 = vpop.xlane.xlu2 %1104  ;;  %v1152_v10 = vmul.f32 %v3704_v40, %v3690_v63  ;;  %vm1158_vm9 = vweird.f32 %v3704_v40 }
 0x385   :  { %vm3776_vm15 = vmor %vm1157_vm8, %vm1158_vm9 }
 0x386   :  { %v1153_v8 = vmul.f32 %v3704_v40, %v1152_v10 }
 0x388   :  { %v1154_v5 = vmul.f32 0.5, %v1153_v8 }
 0x38a   :  { %v1155_v21 = vsub.f32 1.5, %v1154_v5 }
 0x38c   :  { %v3688_v1 = vpop.xlane.xlu1 %1113  ;;  %v1156_v62 = vmul.f32 %v3704_v40, %v1155_v21 }
 0x38d   :  { %2985 = vrsqrt.f32 %v3688_v1  ;;  %vm1177_vm3 = vweird.f32 %v3688_v1 }
 0x393   :  { %v3706_v22 = vpop.eup %2985 }
 0x394   :  { %v3692_v0 = vpop.xlane.xlu1 %1110  ;;  %v1172_v27 = vmul.f32 %v3706_v22, %v3688_v1  ;;  %vm1178_vm11 = vweird.f32 %v3706_v22 }
 0x395   :  { %2987 = vrsqrt.f32 %v3692_v0 }
 0x396   :  { %2989 = vrsqrt.f32 %v3694_v51  ;;  %v1173_v58 = vmul.f32 %v3706_v22, %v1172_v27 }
 0x398   :  { %v1174_v54 = vmul.f32 0.5, %v1173_v58 }
 0x39a   :  { %v1175_v58 = vsub.f32 1.5, %v1174_v54 }
 0x39b   :  { %v3708_v38 = vpop.eup %2987 }
 0x39c   :  { %v3699_v30 = vpop.xlane.xlu1 %1098  ;;  %v3702_v14 = vpop.xlane.xlu2 %1928  ;;  %v1162_v61 = vmul.f32 %v3708_v38, %v3692_v0  ;;  %v1176_v21 = vmul.f32 %v3706_v22, %v1175_v58  ;;  %vm1168_vm13 = vweird.f32 %v3708_v38 }
 0x39d   :  { %v1120_v17 = vpop.xlane.xlu0 %1119  ;;  %v3712_v53 = vpop.eup %2989 }
 0x39e   :  { %2991 = vrsqrt.f32 %v1120_v17  ;;  %v1142_v46 = vmul.f32 %v3712_v53, %v3694_v51  ;;  %v1163_v15 = vmul.f32 %v3708_v38, %v1162_v61  ;;  %vm1197_vm6 = vweird.f32 %v1120_v17 }
 0x39f   :  { %2993 = vrsqrt.f32 %v3699_v30  ;;  %vm1148_vm10 = vweird.f32 %v3712_v53 }
 0x3a0   :  { %v1143_v10 = vmul.f32 %v3712_v53, %v1142_v46  ;;  %v1164_v27 = vmul.f32 0.5, %v1163_v15 }
 0x3a4   :  { %v2992_v37 = vpop.eup %2991  ;;  %v3724_v4 = vpop.xlane.xlu1 %1922 }
 0x3a5   :  { %v3716_v29 = vpop.xlane.xlu0 %1116  ;;  %v1192_v50 = vmul.f32 %v2992_v37, %v1120_v17  ;;  %v3728_v34 = vpop.xlane.xlu2 %1919  ;;  %vm1198_vm5 = vweird.f32 %v2992_v37 }
 0x3a6   :  { %2995 = vrsqrt.f32 %v3716_v29  ;;  %v3733_v13 = vpop.eup %2993  ;;  %vm1199_vm7 = vmor %vm1197_vm6, %vm1198_vm5  ;;  %vm1187_vm2 = vweird.f32 %v3716_v29  ;;  %vm1167_vm6 = vweird.f32 %v3692_v0 }
 0x3a7   :  { %v1193_v60 = vmul.f32 %v2992_v37, %v1192_v50  ;;  %2997 = vrsqrt.f32 %v3702_v14  ;;  %v1122_v46 = vmul.f32 %v3733_v13, %v3699_v30  ;;  %vm1179_vm5 = vmor %vm1177_vm3, %vm1178_vm11 }
 0x3a8   :  { %2999 = vrsqrt.f32 %v3724_v4  ;;  %vm1169_vm8 = vmor %vm1167_vm6, %vm1168_vm13  ;;  %v3802_v1 = vsel %vm1179_vm5, %v3706_v22, %v1176_v21  ;;  %v3817_v22 = vsel %vm3776_vm15, %v3704_v40, %v1156_v62  ;;  %vm1127_vm15 = vweird.f32 %v3699_v30 }
 0x3a9   :  { %v1194_v55 = vmul.f32 0.5, %v1193_v60  ;;  %v1144_v60 = vmul.f32 0.5, %v1143_v10  ;;  %3001 = vrsqrt.f32 %v3728_v34  ;;  %v1123_v3 = vmul.f32 %v3733_v13, %v1122_v46 }
 0x3ab   :  { %v1195_v28 = vsub.f32 1.5, %v1194_v55 }
 0x3ac   :  { %v2996_v39 = vpop.eup %2995  ;;  %v3746_v15 = vpop.xlane.xlu1 %1913 }
 0x3ad   :  { %v3735_v50 = vpop.xlane.xlu0 %1101  ;;  %v1196_v7 = vmul.f32 %v2992_v37, %v1195_v28  ;;  %v1182_v61 = vmul.f32 %v2996_v39, %v3716_v29  ;;  %v3739_v8 = vpop.eup %2997  ;;  %v1165_v28 = vsub.f32 1.5, %v1164_v27  ;;  %vm1188_vm12 = vweird.f32 %v2996_v39 }
 0x3ae   :  { %3003 = vrsqrt.f32 %v3735_v50  ;;  %v3758_v54 = vpop.eup %2999  ;;  %vm1189_vm4 = vmor %vm1187_vm2, %vm1188_vm12  ;;  %vm1137_vm12 = vweird.f32 %v3735_v50  ;;  %vm2007_vm3 = vweird.f32 %v3739_v8 }
 0x3af   :  { %v3743_v55 = vsel %vm1199_vm7, %v2992_v37, %v1196_v7  ;;  %v1183_v17 = vmul.f32 %v2996_v39, %v1182_v61  ;;  %v2001_v7 = vmul.f32 %v3739_v8, %v3702_v14  ;;  %v3756_v37 = vpop.xlane.xlu2 %1910  ;;  %v1145_v61 = vsub.f32 1.5, %v1144_v60 }
 0x3b0   :  { %v1216_v5 = vmul.f32 %v3593_v18, %v3743_v55  ;;  %3005 = vrsqrt.f32 %v3746_v15  ;;  %v1981_v25 = vmul.f32 %v3758_v54, %v3724_v4  ;;  %vm1147_vm7 = vweird.f32 %v3694_v51 }
 0x3b1   :  { %v1184_v10 = vmul.f32 0.5, %v1183_v17  ;;  %v3767_v17 = vpop.eup %3001  ;;  %3007 = vrsqrt.f32 %v3756_v37  ;;  %vm1149_vm9 = vmor %vm1147_vm7, %vm1148_vm10  ;;  %vm1128_vm10 = vweird.f32 %v3733_v13  ;;  %vm1987_vm6 = vweird.f32 %v3758_v54 }
 0x3b2   :  { %1249 = vmatpush.msrb.mxu1 %v1216_v5  ;;  %v1166_v5 = vmul.f32 %v3708_v38, %v1165_v28  ;;  %v1124_v28 = vmul.f32 0.5, %v1123_v3  ;;  %vm1129_vm2 = vmor %vm1127_vm15, %vm1128_vm10  ;;  %vm1986_vm10 = vweird.f32 %v3724_v4 }
 0x3b3   :  { %v1185_v11 = vsub.f32 1.5, %v1184_v10  ;;  %v2002_v10 = vmul.f32 %v3739_v8, %v2001_v7  ;;  %v1971_v7 = vmul.f32 %v3767_v17, %v3728_v34 }
 0x3b4   :  { %v3004_v46 = vpop.eup %3003  ;;  %v1125_v45 = vsub.f32 1.5, %v1124_v28 }
 0x3b5   :  { %v3765_v27 = vpop.xlane.xlu0 %1925  ;;  %v1186_v60 = vmul.f32 %v2996_v39, %v1185_v11  ;;  %v1146_v11 = vmul.f32 %v3712_v53, %v1145_v61  ;;  %v1132_v63 = vmul.f32 %v3004_v46, %v3735_v50  ;;  %v2003_v0 = vmul.f32 0.5, %v2002_v10 }
 0x3b6   :  { %3009 = vrsqrt.f32 %v3765_v27  ;;  %v3796_v36 = vpop.eup %3005  ;;  %v1982_v61 = vmul.f32 %v3758_v54, %v1981_v25  ;;  %v1972_v25 = vmul.f32 %v3767_v17, %v1971_v7  ;;  %vm1138_vm11 = vweird.f32 %v3004_v46 }
 0x3b7   :  { %v3794_v29 = vsel %vm1189_vm4, %v2996_v39, %v1186_v60  ;;  %v1133_v3 = vmul.f32 %v3004_v46, %v1132_v63  ;;  %v3810_v60 = vsel %vm1169_vm8, %v3708_v38, %v1166_v5  ;;  %v3812_v51 = vpop.eup %3007  ;;  %v3820_v21 = vsel %vm1149_vm9, %v3712_v53, %v1146_v11  ;;  %vm1139_vm13 = vmor %vm1137_vm12, %vm1138_vm11 }
 0x3b8   :  { %v1215_v39 = vmul.f32 %v3627_v26, %v3794_v29  ;;  %v1951_v38 = vmul.f32 %v3796_v36, %v3746_v15  ;;  %v1214_v5 = vmul.f32 %v3525_v31, %v3802_v1  ;;  %v1213_v40 = vmul.f32 %v3556_v9, %v3810_v60  ;;  %vm1988_vm12 = vmor %vm1986_vm10, %vm1987_vm6 }
 0x3b9   :  { %v1134_v47 = vmul.f32 0.5, %v1133_v3  ;;  %v2004_v53 = vsub.f32 1.5, %v2003_v0  ;;  %v1983_v11 = vmul.f32 0.5, %v1982_v61  ;;  %v1941_v63 = vmul.f32 %v3812_v51, %v3756_v37 }
 0x3ba   :  { %1250 = vmatpush.msrb.mxu1 %v1215_v39  ;;  %v1126_v7 = vmul.f32 %v3733_v13, %v1125_v45  ;;  %v1973_v39 = vmul.f32 0.5, %v1972_v25  ;;  %v1952_v49 = vmul.f32 %v3796_v36, %v1951_v38  ;;  %v1212_v0 = vmul.f32 %v3428_v24, %v3817_v22 }
 0x3bb   :  { %v1135_v58 = vsub.f32 1.5, %v1134_v47  ;;  %v2005_v45 = vmul.f32 %v3739_v8, %v2004_v53  ;;  %v1984_v50 = vsub.f32 1.5, %v1983_v11  ;;  %v1942_v25 = vmul.f32 %v3812_v51, %v1941_v63 }
 0x3bc   :  { %v3010_v10 = vpop.eup %3009  ;;  %1251 = vmatpush.msrb.mxu1 %v1214_v5  ;;  %v1211_v5 = vmul.f32 %v3484_v33, %v3820_v21  ;;  %vm2006_vm4 = vweird.f32 %v3702_v14  ;;  %v1130_v38 = vsel %vm1129_vm2, %v3733_v13, %v1126_v7  ;;  %vm1996_vm8 = vweird.f32 %v3765_v27 }
 0x3bd   :  { %v3828_v28 = vpop.xlane.xlu0 %1916  ;;  %v1991_v62 = vmul.f32 %v3010_v10, %v3765_v27  ;;  %v1136_v3 = vmul.f32 %v3004_v46, %v1135_v58  ;;  %vm1997_vm5 = vweird.f32 %v3010_v10  ;;  %vm2008_vm7 = vmor %vm2006_vm4, %vm2007_vm3  ;;  %v1943_v63 = vmul.f32 0.5, %v1942_v25  ;;  %v3873_v27 = vld [vmem:[%s4677_s6] sm:$0xf] }
 0x3be   :  { %3011 = vrsqrt.f32 %v3828_v28  ;;  %1252 = vmatpush.msrb.mxu1 %v1213_v40  ;;  %v3864_v13 = vsel %vm2008_vm7, %v3739_v8, %v2005_v45  ;;  %vm1998_vm9 = vmor %vm1996_vm8, %vm1997_vm5  ;;  %v1209_v7 = vmul.f32 %v3575_v56, %v1130_v38  ;;  %vm1977_vm11 = vweird.f32 %v3767_v17 }
 0x3bf   :  { %v1992_v47 = vmul.f32 %v3010_v10, %v1991_v62  ;;  %v3844_v6 = vsel %vm1139_vm13, %v3004_v46, %v1136_v3  ;;  %v1974_v46 = vsub.f32 1.5, %v1973_v39  ;;  %v1953_v62 = vmul.f32 0.5, %v1952_v49 }
 0x3c0   :  { %1253 = vmatpush.msrb.mxu1 %v1212_v0  ;;  %v1210_v40 = vmul.f32 %v3651_v59, %v3844_v6  ;;  %v1985_v49 = vmul.f32 %v3758_v54, %v1984_v50  ;;  %vm1976_vm13 = vweird.f32 %v3728_v34  ;;  %v1944_v4 = vsub.f32 1.5, %v1943_v63 }
 0x3c1   :  { %v1993_v61 = vmul.f32 0.5, %v1992_v47  ;;  %v1201_v47 = vmul.f32 %v1130_v38, %v3587_v43  ;;  %v1975_v8 = vmul.f32 %v3767_v17, %v1974_v46  ;;  %v1954_v0 = vsub.f32 1.5, %v1953_v62  ;;  %vm1978_vm15 = vmor %vm1976_vm13, %vm1977_vm11 }
 0x3c2   :  { %1254 = vmatpush.msrb.mxu1 %v1211_v5  ;;  %v2025_v43 = vmul.f32 %v3593_v18, %v3864_v13  ;;  %v3891_v5 = vsel %vm1988_vm12, %v3758_v54, %v1985_v49  ;;  %vm1957_vm3 = vweird.f32 %v3796_v36  ;;  %vm1966_vm4 = vweird.f32 %v3828_v28 }
 0x3c3   :  { %v1994_v30 = vsub.f32 1.5, %v1993_v61  ;;  %v1955_v25 = vmul.f32 %v3796_v36, %v1954_v0  ;;  %v2023_v54 = vmul.f32 %v3525_v31, %v3891_v5  ;;  %vm1956_vm5 = vweird.f32 %v3746_v15 }
 0x3c4   :  { %v3012_v58 = vpop.eup %3011  ;;  %1255 = vmatpush.msrb.mxu1 %v1210_v40  ;;  %vm1947_vm6 = vweird.f32 %v3812_v51  ;;  %vm1958_vm8 = vmor %vm1956_vm5, %vm1957_vm3  ;;  %v1202_v31 = vmul.f32 %v3844_v6, %v3661_v57 }
 0x3c5   :  { %v3856_v53 = vpop.xlane.xlu0 %1907  ;;  %v1995_v11 = vmul.f32 %v3010_v10, %v1994_v30  ;;  %v1961_v14 = vmul.f32 %v3012_v58, %v3828_v28  ;;  %vm1967_vm2 = vweird.f32 %v3012_v58  ;;  %v1945_v30 = vmul.f32 %v3812_v51, %v1944_v4 }
 0x3c6   :  { %3013 = vrsqrt.f32 %v3856_v53  ;;  %1256 = vmatpush.msrb.mxu1 %v1209_v7  ;;  %vm1968_vm7 = vmor %vm1966_vm4, %vm1967_vm2  ;;  %v3915_v62 = vsel %vm1958_vm8, %v3796_v36, %v1955_v25  ;;  %vm1936_vm12 = vweird.f32 %v3856_v53 }
 0x3c7   :  { %v1962_v3 = vmul.f32 %v3012_v58, %v1961_v14  ;;  %v3875_v39 = vsel %vm1998_vm9, %v3010_v10, %v1995_v11  ;;  %2701 = vmatmul.msk.f32.vlgmr.msrb.gmra.mxu1 %vm1096_vm14, %v1201_v47  ;;  %vm1946_vm9 = vweird.f32 %v3756_v37  ;;  %v2020_v37 = vmul.f32 %v3484_v33, %v3915_v62 }
 0x3c8   :  { %v2024_v10 = vmul.f32 %v3627_v26, %v3875_v39  ;;  %2734 = vmatpush.msk.msra.mxu1 %vm157_vm0, %v3873_v27  ;;  %v3897_v26 = vsel %vm1978_vm15, %v3767_v17, %v1975_v8  ;;  %vm1948_vm10 = vmor %vm1946_vm9, %vm1947_vm6  ;;  %v1204_v33 = vmul.f32 %v3817_v22, %v3462_v23  ;;  %v1208_v23 = vmul.f32 %v3743_v55, %v3605_v32  ;;  %v3967_v32 = vld [vmem:[%s4678_s5] sm:$0xf] }
 0x3c9   :  { %v1963_v61 = vmul.f32 0.5, %v1962_v3  ;;  %v2022_v17 = vmul.f32 %v3556_v9, %v3897_v26  ;;  %v3919_v9 = vsel %vm1948_vm10, %v3812_v51, %v1945_v30  ;;  %v1203_v51 = vmul.f32 %v3820_v21, %v3491_v35  ;;  %2717 = vmatpush.msk.msrb.mxu0 %vm157_vm0, %v3967_v32 }
 0x3ca   :  { %2058 = vmatpush.msrb.mxu1 %v2025_v43  ;;  %v2019_v36 = vmul.f32 %v3651_v59, %v3919_v9  ;;  %v1205_v59 = vmul.f32 %v3810_v60, %v3566_v19  ;;  %v1207_v35 = vmul.f32 %v3794_v29, %v3638_v2 }
 0x3cb   :  { %v1964_v50 = vsub.f32 1.5, %v1963_v61 }
 0x3cc   :  { %v3014_v45 = vpop.eup %3013  ;;  %2059 = vmatpush.msrb.mxu1 %v2024_v10 }
 0x3cd   :  { %v1931_v18 = vmul.f32 %v3014_v45, %v3856_v53  ;;  %v1965_v34 = vmul.f32 %v3012_v58, %v1964_v50  ;;  %vm1937_vm11 = vweird.f32 %v3014_v45 }
 0x3ce   :  { %2060 = vmatpush.msrb.mxu1 %v2023_v54  ;;  %vm1938_vm13 = vmor %vm1936_vm12, %vm1937_vm11 }
 0x3cf   :  { %v1932_v38 = vmul.f32 %v3014_v45, %v1931_v18  ;;  %v3908_v28 = vsel %vm1968_vm7, %v3012_v58, %v1965_v34  ;;  %2702 = vmatmul.msk.f32.gmra.mxu1 %vm1096_vm14, %v1202_v31  ;;  %v1206_v58 = vmul.f32 %v3802_v1, %v3545_v44 }
 0x3d0   :  { %v2021_v15 = vmul.f32 %v3428_v24, %v3908_v28  ;;  %2061 = vmatpush.msrb.mxu1 %v2022_v17 }
 0x3d1   :  { %v1933_v46 = vmul.f32 0.5, %v1932_v38 }
 0x3d2   :  { %2062 = vmatpush.msrb.mxu1 %v2021_v15 }
 0x3d3   :  { %v1934_v40 = vsub.f32 1.5, %v1933_v46 }
 0x3d4   :  { %2063 = vmatpush.msrb.mxu1 %v2020_v37 }
 0x3d5   :  { %v1935_v6 = vmul.f32 %v3014_v45, %v1934_v40 }
 0x3d6   :  { %2064 = vmatpush.msrb.mxu1 %v2019_v36 }
 0x3d7   :  { %v3926_v24 = vsel %vm1938_vm13, %v3014_v45, %v1935_v6  ;;  %2703 = vmatmul.msk.f32.gmra.mxu1 %vm1096_vm14, %v1203_v51  ;;  %v2011_v51 = vmul.f32 %v3919_v9, %v3658_v16  ;;  %v2015_v16 = vmul.f32 %v3891_v5, %v3632_v42 }
 0x3d8   :  { %v2018_v57 = vmul.f32 %v3575_v56, %v3926_v24 }
 0x3da   :  { %2065 = vmatpush.msrb.mxu1 %v2018_v57  ;;  %v2010_v57 = vmul.f32 %v3926_v24, %v3684_v12  ;;  %v2014_v12 = vmul.f32 %v3897_v26, %v3635_v41 }
 0x3df   :  { %2704 = vmatmul.msk.f32.gmra.mxu1 %vm1096_vm14, %v1204_v33  ;;  %v2012_v33 = vmul.f32 %v3915_v62, %v3655_v20  ;;  %v2016_v20 = vmul.f32 %v3875_v39, %v3671_v52  ;;  %v4714_v62 = vld [vmem:[#allocation11_spill] sm:$0xff] }
 0x3e7   :  { %2705 = vmatmul.msk.f32.gmra.mxu1 %vm1096_vm14, %v1205_v59  ;;  %v2013_v59 = vmul.f32 %v3908_v28, %v3677_v48  ;;  %v2017_v48 = vmul.f32 %v3864_v13, %v4714_v62 }
 0x3ef   :  { %2706 = vmatmul.msk.f32.gmra.mxu1 %vm1096_vm14, %v1206_v58 }
 0x3f7   :  { %2707 = vmatmul.msk.f32.gmra.mxu1 %vm1096_vm14, %v1207_v35 }
 0x3ff   :  { %2708 = vmatmul.msk.f32.gmra.mxu1 %vm1096_vm14, %v1208_v23 }
 0x444   :  { %v3948_v56 = vpop.f32.mrf.mxu1 }
 0x445   :  { %2709 = vmatmul.msk.f32.vlgmr.msra.gmra.mxu2 %vm1096_vm14, %v3948_v56 }
 0x44c   :  { %v3952_v19 = vpop.f32.mrf.mxu1 }
 0x44d   :  { %2710 = vmatmul.msk.f32.gmra.mxu2 %vm1096_vm14, %v3952_v19 }
 0x454   :  { %v3956_v44 = vpop.f32.mrf.mxu1 }
 0x455   :  { %2711 = vmatmul.msk.f32.gmra.mxu2 %vm1096_vm14, %v3956_v44 }
 0x45c   :  { %v3960_v2 = vpop.f32.mrf.mxu1 }
 0x45d   :  { %2712 = vmatmul.msk.f32.gmra.mxu2 %vm1096_vm14, %v3960_v2 }
 0x464   :  { %v3971_v55 = vpop.f32.mrf.mxu1 }
 0x465   :  { %2713 = vmatmul.msk.f32.gmra.mxu2 %vm1096_vm14, %v3971_v55 }
 0x46c   :  { %v3975_v29 = vpop.f32.mrf.mxu1 }
 0x46d   :  { %2714 = vmatmul.msk.f32.gmra.mxu2 %vm1096_vm14, %v3975_v29 }
 0x474   :  { %v3979_v1 = vpop.f32.mrf.mxu1 }
 0x475   :  { %2715 = vmatmul.msk.f32.gmra.mxu2 %vm1096_vm14, %v3979_v1 }
 0x47c   :  { %v3983_v60 = vpop.f32.mrf.mxu1 }
 0x47d   :  { %2716 = vmatmul.msk.f32.gmra.mxu2 %vm1096_vm14, %v3983_v60 }
 0x4c8   :  { %v1323_v22 = vpop.f32.mrf.mxu2 }
 0x4c9   :  { %2718 = vmatmul.msk.f32.vlgmr.msrb.gmra.mxu0 %vm110_vm1, %v1323_v22 }
 0x4d0   :  { %v1326_v21 = vpop.f32.mrf.mxu2 }
 0x4d1   :  { %2719 = vmatmul.msk.f32.gmra.mxu0 %vm110_vm1, %v1326_v21 }
 0x4d8   :  { %v1329_v53 = vpop.f32.mrf.mxu2 }
 0x4d9   :  { %2720 = vmatmul.msk.f32.gmra.mxu0 %vm110_vm1, %v1329_v53 }
 0x4e0   :  { %v1332_v11 = vpop.f32.mrf.mxu2 }
 0x4e1   :  { %2721 = vmatmul.msk.f32.gmra.mxu0 %vm110_vm1, %v1332_v11  ;;  %v4715_v11 = vld [vmem:[#allocation10_spill] sm:$0xff] }
 0x4e8   :  { %v1335_v14 = vpop.f32.mrf.mxu2 }
 0x4e9   :  { %2722 = vmatmul.msk.f32.gmra.mxu0 %vm110_vm1, %v1335_v14  ;;  %v4716_v14 = vmax.f32 %v4715_v11, 0.0 }
 0x4f0   :  { %v1338_v49 = vpop.f32.mrf.mxu2 }
 0x4f1   :  { %2723 = vmatmul.msk.f32.gmra.mxu0 %vm110_vm1, %v1338_v49  ;;  %v4717_v49 = vld [vmem:[#allocation9_spill] sm:$0xff] }
 0x4f8   :  { %v1341_v63 = vpop.f32.mrf.mxu2 }
 0x4f9   :  { %2724 = vmatmul.msk.f32.gmra.mxu0 %vm110_vm1, %v1341_v63  ;;  %v4718_v63 = vmax.f32 %v4717_v49, 0.0 }
 0x500   :  { %v1344_v7 = vpop.f32.mrf.mxu2 }
 0x501   :  { %2725 = vmatmul.msk.f32.gmra.mxu0 %vm110_vm1, %v1344_v7  ;;  %v4719_v7 = vld [vmem:[#allocation8_spill] sm:$0xff] }
 0x546   :  { %v1391_v3 = vpop.f32.mrf.mxu0 }
 0x547   :  { %v1415_v38 = vmax.f32 %v1391_v3, 0.0  ;;  %v4720_v3 = vmax.f32 %v4719_v7, 0.0 }
 0x54e   :  { %v1394_v47 = vpop.f32.mrf.mxu0 }
 0x54f   :  { %v1416_v30 = vmax.f32 %v1394_v47, 0.0  ;;  %v4721_v47 = vld [vmem:[#allocation7_spill] sm:$0xff] }
 0x556   :  { %v1397_v8 = vpop.f32.mrf.mxu0 }
 0x557   :  { %v1417_v54 = vmax.f32 %v1397_v8, 0.0  ;;  %v4722_v8 = vmax.f32 %v4721_v47, 0.0 }
 0x55e   :  { %v1400_v0 = vpop.f32.mrf.mxu0 }
 0x55f   :  { %v1418_v34 = vmax.f32 %v1400_v0, 0.0  ;;  %v4723_v0 = vld [vmem:[#allocation6_spill] sm:$0xff] }
 0x566   :  { %v1403_v61 = vpop.f32.mrf.mxu0 }
 0x567   :  { %v1419_v18 = vmax.f32 %v1403_v61, 0.0  ;;  %v4724_v61 = vmax.f32 %v4723_v0, 0.0 }
 0x56e   :  { %v1406_v43 = vpop.f32.mrf.mxu0 }
 0x56f   :  { %v1420_v25 = vmax.f32 %v1406_v43, 0.0  ;;  %v4725_v43 = vld [vmem:[#allocation5_spill] sm:$0xff] }
 0x576   :  { %v1409_v10 = vpop.f32.mrf.mxu0 }
 0x577   :  { %v1421_v50 = vmax.f32 %v1409_v10, 0.0  ;;  %v4727_v10 = vld [vmem:[#allocation4_spill] sm:$0xff] }
 0x57e   :  { %v1412_v4 = vpop.f32.mrf.mxu0 }
 0x57f   :  { %v1422_v45 = vmax.f32 %v1412_v4, 0.0  ;;  %v4728_v4 = vmax.f32 %v4727_v10, 0.0 }
 0x581   :  { %1431 = vmatpush.msrb.mxu3 %v1422_v45  ;;  %v4729_v45 = vld [vmem:[#allocation3_spill] sm:$0xff] }
 0x583   :  { %1432 = vmatpush.msrb.mxu3 %v1421_v50  ;;  %v4730_v50 = vmax.f32 %v4729_v45, 0.0 }
 0x585   :  { %1433 = vmatpush.msrb.mxu3 %v1420_v25 }
 0x587   :  { %1434 = vmatpush.msrb.mxu3 %v1419_v18 }
 0x589   :  { %1435 = vmatpush.msrb.mxu3 %v1418_v34 }
 0x58b   :  { %1436 = vmatpush.msrb.mxu3 %v1417_v54 }
 0x58d   :  { %1437 = vmatpush.msrb.mxu3 %v1416_v30 }
 0x58f   :  { %1438 = vmatpush.msrb.mxu3 %v1415_v38 }
 0x590   :  { %2726 = vmatmul.msk.f32.vlgmr.msrb.gmra.mxu3 %vm1096_vm14, %v3948_v56 }
 0x598   :  { %2727 = vmatmul.msk.f32.gmra.mxu3 %vm1096_vm14, %v3952_v19 }
 0x5a0   :  { %2728 = vmatmul.msk.f32.gmra.mxu3 %vm1096_vm14, %v3956_v44 }
 0x5a8   :  { %2729 = vmatmul.msk.f32.gmra.mxu3 %vm1096_vm14, %v3960_v2 }
 0x5b0   :  { %2730 = vmatmul.msk.f32.gmra.mxu3 %vm1096_vm14, %v3971_v55 }
 0x5b8   :  { %2731 = vmatmul.msk.f32.gmra.mxu3 %vm1096_vm14, %v3975_v29 }
 0x5c0   :  { %2732 = vmatmul.msk.f32.gmra.mxu3 %vm1096_vm14, %v3979_v1 }
 0x5c8   :  { %2733 = vmatmul.msk.f32.gmra.mxu3 %vm1096_vm14, %v3983_v60 }
 0x613   :  { %v1440_v17 = vpop.f32.mrf.mxu3 }
 0x614   :  { %2735 = vmatmul.msk.f32.vlgmr.msra.gmra.mxu1 %vm110_vm1, %v1440_v17 }
 0x61b   :  { %v1443_v46 = vpop.f32.mrf.mxu3 }
 0x61c   :  { %2736 = vmatmul.msk.f32.gmra.mxu1 %vm110_vm1, %v1443_v46 }
 0x623   :  { %v1446_v31 = vpop.f32.mrf.mxu3 }
 0x624   :  { %2737 = vmatmul.msk.f32.gmra.mxu1 %vm110_vm1, %v1446_v31 }
 0x62b   :  { %v1449_v15 = vpop.f32.mrf.mxu3 }
 0x62c   :  { %2738 = vmatmul.msk.f32.gmra.mxu1 %vm110_vm1, %v1449_v15 }
 0x633   :  { %v1452_v40 = vpop.f32.mrf.mxu3 }
 0x634   :  { %2739 = vmatmul.msk.f32.gmra.mxu1 %vm110_vm1, %v1452_v40 }
 0x63b   :  { %v1455_v37 = vpop.f32.mrf.mxu3 }
 0x63c   :  { %2740 = vmatmul.msk.f32.gmra.mxu1 %vm110_vm1, %v1455_v37 }
 0x643   :  { %v1458_v6 = vpop.f32.mrf.mxu3 }
 0x644   :  { %2741 = vmatmul.msk.f32.gmra.mxu1 %vm110_vm1, %v1458_v6 }
 0x64b   :  { %v1461_v36 = vpop.f32.mrf.mxu3 }
 0x64c   :  { %2742 = vmatmul.msk.f32.gmra.mxu1 %vm110_vm1, %v1461_v36 }
 0x654   :  { %2792 = vmatmul.msk.f32.vlgmr.msrb.gmra.mxu1 %vm1096_vm14, %v2010_v57 }
 0x65c   :  { %2793 = vmatmul.msk.f32.gmra.mxu1 %vm1096_vm14, %v2011_v51 }
 0x664   :  { %2794 = vmatmul.msk.f32.gmra.mxu1 %vm1096_vm14, %v2012_v33 }
 0x66c   :  { %2795 = vmatmul.msk.f32.gmra.mxu1 %vm1096_vm14, %v2013_v59 }
 0x674   :  { %2796 = vmatmul.msk.f32.gmra.mxu1 %vm1096_vm14, %v2014_v12 }
 0x67c   :  { %2797 = vmatmul.msk.f32.gmra.mxu1 %vm1096_vm14, %v2015_v16 }
 0x684   :  { %2798 = vmatmul.msk.f32.gmra.mxu1 %vm1096_vm14, %v2016_v20 }
 0x68c   :  { %2799 = vmatmul.msk.f32.gmra.mxu1 %vm1096_vm14, %v2017_v48 }
 0x691   :  { %v1508_v28 = vpop.f32.mrf.mxu1 }
 0x692   :  { %v1532_v53 = vmax.f32 %v1508_v28, 0.0 }
 0x699   :  { %v1511_v9 = vpop.f32.mrf.mxu1 }
 0x69a   :  { %v1533_v21 = vmax.f32 %v1511_v9, 0.0 }
 0x6a1   :  { %v1514_v41 = vpop.f32.mrf.mxu1 }
 0x6a2   :  { %v1534_v13 = vmax.f32 %v1514_v41, 0.0 }
 0x6a9   :  { %v1517_v26 = vpop.f32.mrf.mxu1 }
 0x6aa   :  { %v1535_v39 = vmax.f32 %v1517_v26, 0.0 }
 0x6b1   :  { %v1520_v24 = vpop.f32.mrf.mxu1 }
 0x6b2   :  { %v1536_v52 = vmax.f32 %v1520_v24, 0.0 }
 0x6b9   :  { %v1523_v58 = vpop.f32.mrf.mxu1 }
 0x6ba   :  { %v1537_v22 = vmax.f32 %v1523_v58, 0.0 }
 0x6c1   :  { %v1526_v35 = vpop.f32.mrf.mxu1 }
 0x6c2   :  { %v1538_v23 = vmax.f32 %v1526_v35, 0.0 }
 0x6c9   :  { %v1529_v42 = vpop.f32.mrf.mxu1 }
 0x6ca   :  { %v1539_v5 = vmax.f32 %v1529_v42, 0.0 }
 0x6cc   :  { %1548 = vmatpush.msrb.mxu2 %v1539_v5 }
 0x6ce   :  { %1549 = vmatpush.msrb.mxu2 %v1538_v23 }
 0x6d0   :  { %1550 = vmatpush.msrb.mxu2 %v1537_v22 }
 0x6d2   :  { %1551 = vmatpush.msrb.mxu2 %v1536_v52 }
 0x6d4   :  { %1552 = vmatpush.msrb.mxu2 %v1535_v39 }
 0x6d6   :  { %1553 = vmatpush.msrb.mxu2 %v1534_v13 }
 0x6d8   :  { %1554 = vmatpush.msrb.mxu2 %v1533_v21 }
 0x6da   :  { %1555 = vmatpush.msrb.mxu2 %v1532_v53 }
 0x6db   :  { %2743 = vmatmul.msk.f32.vlgmr.msrb.gmra.mxu2 %vm1096_vm14, %v3948_v56  ;;  %v4726_v56 = vmax.f32 %v4725_v43, 0.0 }
 0x6dc   :  { %2123 = vmatpush.msra.mxu2 %v4716_v14 }
 0x6de   :  { %2124 = vmatpush.msra.mxu2 %v4718_v63 }
 0x6e0   :  { %2125 = vmatpush.msra.mxu2 %v4720_v3 }
 0x6e2   :  { %2126 = vmatpush.msra.mxu2 %v4722_v8 }
 0x6e3   :  { %2744 = vmatmul.msk.f32.gmra.mxu2 %vm1096_vm14, %v3952_v19  ;;  %v4075_v19 = vpop.f32.mrf.mxu1 }
 0x6e4   :  { %2127 = vmatpush.msra.mxu2 %v4724_v61 }
 0x6e6   :  { %2128 = vmatpush.msra.mxu2 %v4726_v56 }
 0x6e8   :  { %2129 = vmatpush.msra.mxu2 %v4728_v4 }
 0x6ea   :  { %2130 = vmatpush.msra.mxu2 %v4730_v50 }
 0x6eb   :  { %2745 = vmatmul.msk.f32.gmra.mxu2 %vm1096_vm14, %v3956_v44  ;;  %v4079_v44 = vpop.f32.mrf.mxu1 }
 0x6ec   :  { %2825 = vmatpush.msk.msrb.mxu2 %vm157_vm0, %v3873_v27 }
 0x6f3   :  { %2746 = vmatmul.msk.f32.gmra.mxu2 %vm1096_vm14, %v3960_v2  ;;  %v4083_v27 = vpop.f32.mrf.mxu1 }
 0x6fb   :  { %2747 = vmatmul.msk.f32.gmra.mxu2 %vm1096_vm14, %v3971_v55  ;;  %v4087_v2 = vpop.f32.mrf.mxu1  ;;  %v4094_v55 = vld [vmem:[%s4679_s7] sm:$0xf] }
 0x6fc   :  { %2751 = vmatpush.msk.msra.mxu0 %vm157_vm0, %v4094_v55 }
 0x6fe   :  { %2808 = vmatpush.msk.msrb.mxu0 %vm157_vm0, %v3967_v32 }
 0x703   :  { %2748 = vmatmul.msk.f32.gmra.mxu2 %vm1096_vm14, %v3975_v29  ;;  %v4102_v29 = vpop.f32.mrf.mxu1 }
 0x70b   :  { %2749 = vmatmul.msk.f32.gmra.mxu2 %vm1096_vm14, %v3979_v1  ;;  %v4106_v1 = vpop.f32.mrf.mxu1 }
 0x713   :  { %2750 = vmatmul.msk.f32.gmra.mxu2 %vm1096_vm14, %v3983_v60  ;;  %v4110_v60 = vpop.f32.mrf.mxu1 }
 0x71b   :  { %2800 = vmatmul.msk.f32.vlgmr.msra.gmra.mxu2 %vm1096_vm14, %v4075_v19  ;;  %v4114_v25 = vpop.f32.mrf.mxu1 }
 0x723   :  { %2801 = vmatmul.msk.f32.gmra.mxu2 %vm1096_vm14, %v4079_v44 }
 0x72b   :  { %2802 = vmatmul.msk.f32.gmra.mxu2 %vm1096_vm14, %v4083_v27 }
 0x733   :  { %2803 = vmatmul.msk.f32.gmra.mxu2 %vm1096_vm14, %v4087_v2 }
 0x73b   :  { %2804 = vmatmul.msk.f32.gmra.mxu2 %vm1096_vm14, %v4102_v29 }
 0x743   :  { %2805 = vmatmul.msk.f32.gmra.mxu2 %vm1096_vm14, %v4106_v1 }
 0x74b   :  { %2806 = vmatmul.msk.f32.gmra.mxu2 %vm1096_vm14, %v4110_v60 }
 0x753   :  { %2807 = vmatmul.msk.f32.gmra.mxu2 %vm1096_vm14, %v4114_v25 }
 0x75e   :  { %v1557_v32 = vpop.f32.mrf.mxu2 }
 0x75f   :  { %2752 = vmatmul.msk.f32.vlgmr.msra.gmra.mxu0 %vm110_vm1, %v1557_v32 }
 0x766   :  { %v1560_v18 = vpop.f32.mrf.mxu2 }
 0x767   :  { %2753 = vmatmul.msk.f32.gmra.mxu0 %vm110_vm1, %v1560_v18 }
 0x76e   :  { %v1563_v34 = vpop.f32.mrf.mxu2 }
 0x76f   :  { %2754 = vmatmul.msk.f32.gmra.mxu0 %vm110_vm1, %v1563_v34 }
 0x776   :  { %v1566_v54 = vpop.f32.mrf.mxu2 }
 0x777   :  { %2755 = vmatmul.msk.f32.gmra.mxu0 %vm110_vm1, %v1566_v54 }
 0x77e   :  { %v1569_v30 = vpop.f32.mrf.mxu2 }
 0x77f   :  { %2756 = vmatmul.msk.f32.gmra.mxu0 %vm110_vm1, %v1569_v30 }
 0x786   :  { %v1572_v38 = vpop.f32.mrf.mxu2 }
 0x787   :  { %2757 = vmatmul.msk.f32.gmra.mxu0 %vm110_vm1, %v1572_v38 }
 0x78e   :  { %v1575_v17 = vpop.f32.mrf.mxu2 }
 0x78f   :  { %2758 = vmatmul.msk.f32.gmra.mxu0 %vm110_vm1, %v1575_v17 }
 0x796   :  { %v1578_v46 = vpop.f32.mrf.mxu2 }
 0x797   :  { %2759 = vmatmul.msk.f32.gmra.mxu0 %vm110_vm1, %v1578_v46 }
 0x79e   :  { %v2132_v31 = vpop.f32.mrf.mxu2 }
 0x79f   :  { %2809 = vmatmul.msk.f32.vlgmr.msrb.gmra.mxu0 %vm110_vm1, %v2132_v31 }
 0x7a6   :  { %v2135_v15 = vpop.f32.mrf.mxu2 }
 0x7a7   :  { %2810 = vmatmul.msk.f32.gmra.mxu0 %vm110_vm1, %v2135_v15  ;;  %v4194_v15 = vld [vmem:[%s4680_s8 + $0x8] sm:$0xff] }
 0x7ae   :  { %v2138_v40 = vpop.f32.mrf.mxu2 }
 0x7af   :  { %2811 = vmatmul.msk.f32.gmra.mxu0 %vm110_vm1, %v2138_v40  ;;  %v4201_v40 = vld [vmem:[%s4680_s8 + $0x10] sm:$0xff] }
 0x7b6   :  { %v2141_v37 = vpop.f32.mrf.mxu2 }
 0x7b7   :  { %2812 = vmatmul.msk.f32.gmra.mxu0 %vm110_vm1, %v2141_v37  ;;  %v4208_v37 = vld [vmem:[%s4680_s8 + $0x18] sm:$0xff] }
 0x7be   :  { %v2144_v6 = vpop.f32.mrf.mxu2 }
 0x7bf   :  { %2813 = vmatmul.msk.f32.gmra.mxu0 %vm110_vm1, %v2144_v6  ;;  %v4215_v6 = vld [vmem:[%s4680_s8 + $0x20] sm:$0xff] }
 0x7c6   :  { %v2147_v36 = vpop.f32.mrf.mxu2 }
 0x7c7   :  { %2814 = vmatmul.msk.f32.gmra.mxu0 %vm110_vm1, %v2147_v36  ;;  %v4222_v36 = vld [vmem:[%s4680_s8 + $0x28] sm:$0xff] }
 0x7ce   :  { %v2150_v57 = vpop.f32.mrf.mxu2 }
 0x7cf   :  { %2815 = vmatmul.msk.f32.gmra.mxu0 %vm110_vm1, %v2150_v57  ;;  %v4229_v57 = vld [vmem:[%s4680_s8 + $0x30] sm:$0xff] }
 0x7d6   :  { %v2153_v51 = vpop.f32.mrf.mxu2 }
 0x7d7   :  { %2816 = vmatmul.msk.f32.gmra.mxu0 %vm110_vm1, %v2153_v51  ;;  %v4236_v51 = vld [vmem:[%s4680_s8 + $0x38] sm:$0xff] }
 0x7dc   :  { %v1625_v33 = vpop.f32.mrf.mxu0 }
 0x7e4   :  { %v1628_v59 = vpop.f32.mrf.mxu0 }
 0x7ec   :  { %v1631_v12 = vpop.f32.mrf.mxu0 }
 0x7f4   :  { %v1634_v16 = vpop.f32.mrf.mxu0 }
 0x7fc   :  { %v1637_v20 = vpop.f32.mrf.mxu0 }
 0x804   :  { %v1640_v62 = vpop.f32.mrf.mxu0 }
 0x80c   :  { %v1643_v48 = vpop.f32.mrf.mxu0 }
 0x814   :  { %v1646_v28 = vpop.f32.mrf.mxu0 }
 0x815   :  { %1753 = vmatpush.msra.mxu3 %v1646_v28  ;;  %v4271_v28 = vld [vmem:[%s4680_s8 + $0x60] sm:$0xff] }
 0x817   :  { %1754 = vmatpush.msra.mxu3 %v1643_v48 }
 0x819   :  { %1755 = vmatpush.msra.mxu3 %v1640_v62  ;;  %v4264_v62 = vld [vmem:[%s4680_s8 + $0x58] sm:$0xff] }
 0x81b   :  { %1756 = vmatpush.msra.mxu3 %v1637_v20 }
 0x81c   :  { %v2197_v9 = vpop.f32.mrf.mxu0 }
 0x81d   :  { %1757 = vmatpush.msra.mxu3 %v1634_v16  ;;  %v2221_v11 = vmax.f32 %v2197_v9, 0.0  ;;  %v4257_v16 = vld [vmem:[%s4680_s8 + $0x50] sm:$0xff] }
 0x81f   :  { %1758 = vmatpush.msra.mxu3 %v1631_v12 }
 0x821   :  { %1759 = vmatpush.msra.mxu3 %v1628_v59  ;;  %v4250_v59 = vld [vmem:[%s4680_s8 + $0x48] sm:$0xff] }
 0x823   :  { %1760 = vmatpush.msra.mxu3 %v1625_v33  ;;  %v4243_v33 = vld [vmem:[%s4680_s8 + $0x40] sm:$0xff] }
 0x824   :  { %v2200_v41 = vpop.f32.mrf.mxu0 }
 0x825   :  { %v2222_v53 = vmax.f32 %v2200_v41, 0.0  ;;  %v4278_v41 = vld [vmem:[%s4680_s8 + $0x68] sm:$0xff] }
 0x82c   :  { %v2203_v26 = vpop.f32.mrf.mxu0 }
 0x82d   :  { %v2223_v21 = vmax.f32 %v2203_v26, 0.0 }
 0x834   :  { %v2206_v24 = vpop.f32.mrf.mxu0 }
 0x835   :  { %v2224_v13 = vmax.f32 %v2206_v24, 0.0  ;;  %v4285_v24 = vld [vmem:[%s4680_s8 + $0x70] sm:$0xff] }
 0x83c   :  { %v2209_v58 = vpop.f32.mrf.mxu0 }
 0x83d   :  { %v2225_v39 = vmax.f32 %v2209_v58, 0.0 }
 0x844   :  { %v2212_v35 = vpop.f32.mrf.mxu0 }
 0x845   :  { %v2226_v52 = vmax.f32 %v2212_v35, 0.0  ;;  %v4292_v35 = vld [vmem:[%s4680_s8 + $0x78] sm:$0xff] }
 0x84c   :  { %v2215_v42 = vpop.f32.mrf.mxu0 }
 0x84d   :  { %v2227_v22 = vmax.f32 %v2215_v42, 0.0 }
 0x854   :  { %v2218_v5 = vpop.f32.mrf.mxu0 }
 0x855   :  { %v2228_v23 = vmax.f32 %v2218_v5, 0.0  ;;  %v4299_v5 = vld [vmem:[%s4680_s8 + $0x80] sm:$0xff] }
 0x857   :  { %2237 = vmatpush.msra.mxu1 %v2228_v23 }
 0x859   :  { %2238 = vmatpush.msra.mxu1 %v2227_v22 }
 0x85b   :  { %2239 = vmatpush.msra.mxu1 %v2226_v52  ;;  %v4310_v52 = vld [vmem:[%s4680_s8 + $0x88] sm:$0xff] }
 0x85d   :  { %2240 = vmatpush.msra.mxu1 %v2225_v39 }
 0x85f   :  { %2241 = vmatpush.msra.mxu1 %v2224_v13  ;;  %v61_v13 = vld [vmem:[%s4680_s8 + $0x90] sm:$0xff] }
 0x861   :  { %2242 = vmatpush.msra.mxu1 %v2223_v21 }
 0x863   :  { %2243 = vmatpush.msra.mxu1 %v2222_v53  ;;  %v62_v53 = vld [vmem:[%s4680_s8 + $0x98] sm:$0xff] }
 0x865   :  { %2244 = vmatpush.msra.mxu1 %v2221_v11 }
 0x866   :  { %2817 = vmatmul.msk.f32.vlgmr.msra.gmra.mxu1 %vm1096_vm14, %v4075_v19 }
 0x867   :  { %2842 = vmatpush.msk.msrb.mxu1 %vm157_vm0, %v4094_v55 }
 0x86e   :  { %2818 = vmatmul.msk.f32.gmra.mxu1 %vm1096_vm14, %v4079_v44 }
 0x876   :  { %2819 = vmatmul.msk.f32.gmra.mxu1 %vm1096_vm14, %v4083_v27 }
 0x87e   :  { %2820 = vmatmul.msk.f32.gmra.mxu1 %vm1096_vm14, %v4087_v2 }
 0x886   :  { %2821 = vmatmul.msk.f32.gmra.mxu1 %vm1096_vm14, %v4102_v29 }
 0x88e   :  { %2822 = vmatmul.msk.f32.gmra.mxu1 %vm1096_vm14, %v4106_v1 }
 0x896   :  { %2823 = vmatmul.msk.f32.gmra.mxu1 %vm1096_vm14, %v4110_v60 }
 0x89e   :  { %2824 = vmatmul.msk.f32.gmra.mxu1 %vm1096_vm14, %v4114_v25 }
 0x8e3   :  { %v2246_v14 = vpop.f32.mrf.mxu1 }
 0x8e4   :  { %2826 = vmatmul.msk.f32.vlgmr.msrb.gmra.mxu2 %vm110_vm1, %v2246_v14  ;;  %v63_v14 = vld [vmem:[%s4680_s8 + $0xa0] sm:$0xff] }
 0x8eb   :  { %v2249_v49 = vpop.f32.mrf.mxu1 }
 0x8ec   :  { %2827 = vmatmul.msk.f32.gmra.mxu2 %vm110_vm1, %v2249_v49 }
 0x8f3   :  { %v2252_v63 = vpop.f32.mrf.mxu1 }
 0x8f4   :  { %2828 = vmatmul.msk.f32.gmra.mxu2 %vm110_vm1, %v2252_v63  ;;  %v64_v63 = vld [vmem:[%s4680_s8 + $0xa8] sm:$0xff] }
 0x8fb   :  { %v2255_v7 = vpop.f32.mrf.mxu1 }
 0x8fc   :  { %2829 = vmatmul.msk.f32.gmra.mxu2 %vm110_vm1, %v2255_v7 }
 0x903   :  { %v2258_v3 = vpop.f32.mrf.mxu1 }
 0x904   :  { %2830 = vmatmul.msk.f32.gmra.mxu2 %vm110_vm1, %v2258_v3  ;;  %v65_v3 = vld [vmem:[%s4680_s8 + $0xb0] sm:$0xff] }
 0x90b   :  { %v2261_v47 = vpop.f32.mrf.mxu1 }
 0x90c   :  { %2831 = vmatmul.msk.f32.gmra.mxu2 %vm110_vm1, %v2261_v47 }
 0x913   :  { %v2264_v8 = vpop.f32.mrf.mxu1 }
 0x914   :  { %2832 = vmatmul.msk.f32.gmra.mxu2 %vm110_vm1, %v2264_v8  ;;  %v66_v8 = vld [vmem:[%s4680_s8 + $0xb8] sm:$0xff] }
 0x91b   :  { %v2267_v0 = vpop.f32.mrf.mxu1 }
 0x91c   :  { %2833 = vmatmul.msk.f32.gmra.mxu2 %vm110_vm1, %v2267_v0 }
 0x967   :  { %v2311_v61 = vpop.f32.mrf.mxu2 }
 0x968   :  { %v2335_v46 = vmax.f32 %v2311_v61, 0.0  ;;  %v67_v61 = vld [vmem:[%s4680_s8 + $0xc0] sm:$0xff] }
 0x96f   :  { %v2314_v43 = vpop.f32.mrf.mxu2 }
 0x970   :  { %v2336_v17 = vmax.f32 %v2314_v43, 0.0 }
 0x977   :  { %v2317_v56 = vpop.f32.mrf.mxu2 }
 0x978   :  { %v2337_v38 = vmax.f32 %v2317_v56, 0.0  ;;  %v68_v56 = vld [vmem:[%s4680_s8 + $0xc8] sm:$0xff] }
 0x97f   :  { %v2320_v10 = vpop.f32.mrf.mxu2 }
 0x980   :  { %v2338_v30 = vmax.f32 %v2320_v10, 0.0 }
 0x987   :  { %v2323_v4 = vpop.f32.mrf.mxu2 }
 0x988   :  { %v2339_v54 = vmax.f32 %v2323_v4, 0.0  ;;  %v69_v4 = vld [vmem:[%s4680_s8 + $0xd0] sm:$0xff] }
 0x98f   :  { %v2326_v45 = vpop.f32.mrf.mxu2 }
 0x990   :  { %v2340_v34 = vmax.f32 %v2326_v45, 0.0 }
 0x997   :  { %v2329_v50 = vpop.f32.mrf.mxu2 }
 0x998   :  { %v2341_v18 = vmax.f32 %v2329_v50, 0.0  ;;  %v70_v50 = vld [vmem:[%s4680_s8 + $0xd8] sm:$0xff] }
 0x99f   :  { %v2332_v55 = vpop.f32.mrf.mxu2 }
 0x9a0   :  { %v2342_v32 = vmax.f32 %v2332_v55, 0.0 }
 0x9a2   :  { %2351 = vmatpush.msra.mxu0 %v2342_v32  ;;  %v71_v32 = vld [vmem:[%s4680_s8 + $0xe0] sm:$0xff] }
 0x9a4   :  { %2352 = vmatpush.msra.mxu0 %v2341_v18 }
 0x9a6   :  { %2353 = vmatpush.msra.mxu0 %v2340_v34  ;;  %v72_v34 = vld [vmem:[%s4680_s8 + $0xe8] sm:$0xff] }
 0x9a8   :  { %2354 = vmatpush.msra.mxu0 %v2339_v54 }
 0x9aa   :  { %2355 = vmatpush.msra.mxu0 %v2338_v30  ;;  %v73_v30 = vld [vmem:[%s4680_s8 + $0xf0] sm:$0xff] }
 0x9ac   :  { %2356 = vmatpush.msra.mxu0 %v2337_v38 }
 0x9ae   :  { %2357 = vmatpush.msra.mxu0 %v2336_v17  ;;  %v74_v17 = vld [vmem:[%s4680_s8 + $0xf8] sm:$0xff] }
 0x9b0   :  { %2358 = vmatpush.msra.mxu0 %v2335_v46 }
 0x9b1   :  { %2834 = vmatmul.msk.f32.vlgmr.msra.gmra.mxu0 %vm1096_vm14, %v4075_v19 }
 0x9b9   :  { %2835 = vmatmul.msk.f32.gmra.mxu0 %vm1096_vm14, %v4079_v44 }
 0x9c1   :  { %2836 = vmatmul.msk.f32.gmra.mxu0 %vm1096_vm14, %v4083_v27 }
 0x9c9   :  { %2837 = vmatmul.msk.f32.gmra.mxu0 %vm1096_vm14, %v4087_v2 }
 0x9d1   :  { %2838 = vmatmul.msk.f32.gmra.mxu0 %vm1096_vm14, %v4102_v29 }
 0x9d9   :  { %2839 = vmatmul.msk.f32.gmra.mxu0 %vm1096_vm14, %v4106_v1 }
 0x9e1   :  { %2840 = vmatmul.msk.f32.gmra.mxu0 %vm1096_vm14, %v4110_v60 }
 0x9e9   :  { %2841 = vmatmul.msk.f32.gmra.mxu0 %vm1096_vm14, %v4114_v25  ;;  %v4186_v25 = vld [vmem:[%s4680_s8] sm:$0xff] }
 0x9ea   :  { %2760 = vmatmul.msk.f32.vlgmr.msra.gmra.mxu3 %vm1096_vm14, %v4186_v25 }
 0x9f2   :  { %2761 = vmatmul.msk.f32.gmra.mxu3 %vm1096_vm14, %v4194_v15 }
 0x9fa   :  { %2762 = vmatmul.msk.f32.gmra.mxu3 %vm1096_vm14, %v4201_v40 }
 0xa02   :  { %2763 = vmatmul.msk.f32.gmra.mxu3 %vm1096_vm14, %v4208_v37 }
 0xa0a   :  { %2764 = vmatmul.msk.f32.gmra.mxu3 %vm1096_vm14, %v4215_v6 }
 0xa12   :  { %2765 = vmatmul.msk.f32.gmra.mxu3 %vm1096_vm14, %v4222_v36 }
 0xa1a   :  { %2766 = vmatmul.msk.f32.gmra.mxu3 %vm1096_vm14, %v4229_v57 }
 0xa22   :  { %2767 = vmatmul.msk.f32.gmra.mxu3 %vm1096_vm14, %v4236_v51 }
 0xa2a   :  { %2768 = vmatmul.msk.f32.gmra.mxu3 %vm1096_vm14, %v4243_v33 }
 0xa2e   :  { %v2360_v19 = vpop.f32.mrf.mxu0 }
 0xa2f   :  { %2843 = vmatmul.msk.f32.vlgmr.msrb.gmra.mxu1 %vm110_vm1, %v2360_v19 }
 0xa32   :  { %2769 = vmatmul.msk.f32.gmra.mxu3 %vm1096_vm14, %v4250_v59 }
 0xa36   :  { %v2363_v44 = vpop.f32.mrf.mxu0 }
 0xa37   :  { %2844 = vmatmul.msk.f32.gmra.mxu1 %vm110_vm1, %v2363_v44 }
 0xa3a   :  { %2770 = vmatmul.msk.f32.gmra.mxu3 %vm1096_vm14, %v4257_v16 }
 0xa3e   :  { %v2366_v27 = vpop.f32.mrf.mxu0 }
 0xa3f   :  { %2845 = vmatmul.msk.f32.gmra.mxu1 %vm110_vm1, %v2366_v27 }
 0xa42   :  { %2771 = vmatmul.msk.f32.gmra.mxu3 %vm1096_vm14, %v4264_v62 }
 0xa46   :  { %v2369_v2 = vpop.f32.mrf.mxu0 }
 0xa47   :  { %2846 = vmatmul.msk.f32.gmra.mxu1 %vm110_vm1, %v2369_v2 }
 0xa4a   :  { %2772 = vmatmul.msk.f32.gmra.mxu3 %vm1096_vm14, %v4271_v28 }
 0xa4e   :  { %v2372_v29 = vpop.f32.mrf.mxu0 }
 0xa4f   :  { %2847 = vmatmul.msk.f32.gmra.mxu1 %vm110_vm1, %v2372_v29 }
 0xa52   :  { %2773 = vmatmul.msk.f32.gmra.mxu3 %vm1096_vm14, %v4278_v41 }
 0xa56   :  { %v2375_v1 = vpop.f32.mrf.mxu0 }
 0xa57   :  { %2848 = vmatmul.msk.f32.gmra.mxu1 %vm110_vm1, %v2375_v1 }
 0xa5a   :  { %2774 = vmatmul.msk.f32.gmra.mxu3 %vm1096_vm14, %v4285_v24 }
 0xa5e   :  { %v2378_v60 = vpop.f32.mrf.mxu0 }
 0xa5f   :  { %2849 = vmatmul.msk.f32.gmra.mxu1 %vm110_vm1, %v2378_v60 }
 0xa62   :  { %2775 = vmatmul.msk.f32.gmra.mxu3 %vm1096_vm14, %v4292_v35 }
 0xa66   :  { %v2381_v31 = vpop.f32.mrf.mxu0 }
 0xa67   :  { %2850 = vmatmul.msk.f32.gmra.mxu1 %vm110_vm1, %v2381_v31 }
 0xa6a   :  { %2776 = vmatmul.msk.f32.gmra.mxu3 %vm1096_vm14, %v4299_v5 }
 0xa6d   :  { %v1762_v22 = vpop.f32.mrf.mxu3 }
 0xa6e   :  { %1858 = vst.msk [vmem:[%s4681_s9] sm:$0xff] %vm110_vm1, %v1762_v22 }
 0xa72   :  { %2777 = vmatmul.msk.f32.gmra.mxu3 %vm1096_vm14, %v4310_v52 }
 0xa75   :  { %v1765_v39 = vpop.f32.mrf.mxu3 }
 0xa76   :  { %1859 = vst.msk [vmem:[%s4681_s9 + $0x8] sm:$0xff] %vm110_vm1, %v1765_v39 }
 0xa7a   :  { %2778 = vmatmul.msk.f32.gmra.mxu3 %vm1096_vm14, %v61_v13 }
 0xa7d   :  { %v1768_v21 = vpop.f32.mrf.mxu3 }
 0xa7e   :  { %1860 = vst.msk [vmem:[%s4681_s9 + $0x10] sm:$0xff] %vm110_vm1, %v1768_v21 }
 0xa82   :  { %2779 = vmatmul.msk.f32.gmra.mxu3 %vm1096_vm14, %v62_v53 }
 0xa85   :  { %v1771_v11 = vpop.f32.mrf.mxu3 }
 0xa86   :  { %1861 = vst.msk [vmem:[%s4681_s9 + $0x18] sm:$0xff] %vm110_vm1, %v1771_v11 }
 0xa8a   :  { %2780 = vmatmul.msk.f32.gmra.mxu3 %vm1096_vm14, %v63_v14 }
 0xa8d   :  { %v1774_v49 = vpop.f32.mrf.mxu3 }
 0xa8e   :  { %1862 = vst.msk [vmem:[%s4681_s9 + $0x20] sm:$0xff] %vm110_vm1, %v1774_v49 }
 0xa92   :  { %2781 = vmatmul.msk.f32.gmra.mxu3 %vm1096_vm14, %v64_v63 }
 0xa95   :  { %v1777_v7 = vpop.f32.mrf.mxu3 }
 0xa96   :  { %1863 = vst.msk [vmem:[%s4681_s9 + $0x28] sm:$0xff] %vm110_vm1, %v1777_v7 }
 0xa9a   :  { %2782 = vmatmul.msk.f32.gmra.mxu3 %vm1096_vm14, %v65_v3 }
 0xa9d   :  { %v1780_v47 = vpop.f32.mrf.mxu3 }
 0xa9e   :  { %1864 = vst.msk [vmem:[%s4681_s9 + $0x30] sm:$0xff] %vm110_vm1, %v1780_v47 }
 0xaa2   :  { %2783 = vmatmul.msk.f32.gmra.mxu3 %vm1096_vm14, %v66_v8 }
 0xaa5   :  { %v1783_v0 = vpop.f32.mrf.mxu3 }
 0xaa6   :  { %1865 = vst.msk [vmem:[%s4681_s9 + $0x38] sm:$0xff] %vm110_vm1, %v1783_v0 }
 0xaaa   :  { %2784 = vmatmul.msk.f32.gmra.mxu3 %vm1096_vm14, %v67_v61 }
 0xaac   :  { %v2425_v12 = vpop.f32.mrf.mxu1 }
 0xaad   :  { %v1786_v43 = vpop.f32.mrf.mxu3 }
 0xaae   :  { %1866 = vst.msk [vmem:[%s4681_s9 + $0x40] sm:$0xff] %vm110_vm1, %v1786_v43 }
 0xab2   :  { %2785 = vmatmul.msk.f32.gmra.mxu3 %vm1096_vm14, %v68_v56 }
 0xab4   :  { %v2428_v20 = vpop.f32.mrf.mxu1 }
 0xab5   :  { %v1789_v10 = vpop.f32.mrf.mxu3 }
 0xab6   :  { %1867 = vst.msk [vmem:[%s4681_s9 + $0x48] sm:$0xff] %vm110_vm1, %v1789_v10 }
 0xaba   :  { %2786 = vmatmul.msk.f32.gmra.mxu3 %vm1096_vm14, %v69_v4 }
 0xabc   :  { %v2431_v48 = vpop.f32.mrf.mxu1 }
 0xabd   :  { %v1792_v45 = vpop.f32.mrf.mxu3 }
 0xabe   :  { %1868 = vst.msk [vmem:[%s4681_s9 + $0x50] sm:$0xff] %vm110_vm1, %v1792_v45 }
 0xac2   :  { %2787 = vmatmul.msk.f32.gmra.mxu3 %vm1096_vm14, %v70_v50 }
 0xac4   :  { %v2434_v9 = vpop.f32.mrf.mxu1 }
 0xac5   :  { %v1795_v55 = vpop.f32.mrf.mxu3 }
 0xac6   :  { %1869 = vst.msk [vmem:[%s4681_s9 + $0x58] sm:$0xff] %vm110_vm1, %v1795_v55 }
 0xaca   :  { %2788 = vmatmul.msk.f32.gmra.mxu3 %vm1096_vm14, %v71_v32 }
 0xacc   :  { %v2437_v26 = vpop.f32.mrf.mxu1 }
 0xacd   :  { %v1798_v18 = vpop.f32.mrf.mxu3 }
 0xace   :  { %1870 = vst.msk [vmem:[%s4681_s9 + $0x60] sm:$0xff] %vm110_vm1, %v1798_v18 }
 0xad2   :  { %2789 = vmatmul.msk.f32.gmra.mxu3 %vm1096_vm14, %v72_v34 }
 0xad4   :  { %v2440_v58 = vpop.f32.mrf.mxu1 }
 0xad5   :  { %v1801_v54 = vpop.f32.mrf.mxu3 }
 0xad6   :  { %1871 = vst.msk [vmem:[%s4681_s9 + $0x68] sm:$0xff] %vm110_vm1, %v1801_v54 }
 0xada   :  { %2790 = vmatmul.msk.f32.gmra.mxu3 %vm1096_vm14, %v73_v30 }
 0xadc   :  { %v2443_v42 = vpop.f32.mrf.mxu1 }
 0xadd   :  { %v1804_v38 = vpop.f32.mrf.mxu3 }
 0xade   :  { %1872 = vst.msk [vmem:[%s4681_s9 + $0x70] sm:$0xff] %vm110_vm1, %v1804_v38 }
 0xae2   :  { %2791 = vmatmul.msk.f32.gmra.mxu3 %vm1096_vm14, %v74_v17 }
 0xae4   :  { %v2446_v23 = vpop.f32.mrf.mxu1 }
 0xae5   :  { %2457 = vmatpush.msrb.mxu0 %v2446_v23  ;;  %2926 = vmatpush.msra.mxu2 %v2446_v23  ;;  %v1807_v46 = vpop.f32.mrf.mxu3 }
 0xae6   :  { %1873 = vst.msk [vmem:[%s4681_s9 + $0x78] sm:$0xff] %vm110_vm1, %v1807_v46 }
 0xae7   :  { %2458 = vmatpush.msrb.mxu0 %v2443_v42  ;;  %2927 = vmatpush.msra.mxu2 %v2443_v42 }
 0xae9   :  { %2459 = vmatpush.msrb.mxu0 %v2440_v58  ;;  %2928 = vmatpush.msra.mxu2 %v2440_v58 }
 0xaeb   :  { %2460 = vmatpush.msrb.mxu0 %v2437_v26  ;;  %2929 = vmatpush.msra.mxu2 %v2437_v26 }
 0xaed   :  { %2461 = vmatpush.msrb.mxu0 %v2434_v9  ;;  %2930 = vmatpush.msra.mxu2 %v2434_v9  ;;  %v1810_v19 = vpop.f32.mrf.mxu3 }
 0xaee   :  { %1874 = vst.msk [vmem:[%s4681_s9 + $0x80] sm:$0xff] %vm110_vm1, %v1810_v19 }
 0xaef   :  { %2462 = vmatpush.msrb.mxu0 %v2431_v48  ;;  %2931 = vmatpush.msra.mxu2 %v2431_v48 }
 0xaf1   :  { %2463 = vmatpush.msrb.mxu0 %v2428_v20  ;;  %2932 = vmatpush.msra.mxu2 %v2428_v20 }
 0xaf3   :  { %2464 = vmatpush.msrb.mxu0 %v2425_v12  ;;  %2933 = vmatpush.msra.mxu2 %v2425_v12 }
 0xaf4   :  { %2851 = vmatmul.msk.f32.vlgmr.msrb.gmra.mxu0 %vm1096_vm14, %v4186_v25  ;;  %2869 = vmatmul.msk.f32.vlgmr.msra.gmra.mxu2 %vm1096_vm14, %v61_v13 }
 0xaf5   :  { %v1813_v44 = vpop.f32.mrf.mxu3 }
 0xaf6   :  { %1875 = vst.msk [vmem:[%s4681_s9 + $0x88] sm:$0xff] %vm110_vm1, %v1813_v44 }
 0xafc   :  { %2852 = vmatmul.msk.f32.gmra.mxu0 %vm1096_vm14, %v4194_v15  ;;  %2870 = vmatmul.msk.f32.gmra.mxu2 %vm1096_vm14, %v62_v53 }
 0xafd   :  { %v1816_v2 = vpop.f32.mrf.mxu3 }
 0xafe   :  { %1876 = vst.msk [vmem:[%s4681_s9 + $0x90] sm:$0xff] %vm110_vm1, %v1816_v2 }
 0xb04   :  { %2853 = vmatmul.msk.f32.gmra.mxu0 %vm1096_vm14, %v4201_v40  ;;  %2871 = vmatmul.msk.f32.gmra.mxu2 %vm1096_vm14, %v63_v14 }
 0xb05   :  { %v1819_v60 = vpop.f32.mrf.mxu3 }
 0xb06   :  { %1877 = vst.msk [vmem:[%s4681_s9 + $0x98] sm:$0xff] %vm110_vm1, %v1819_v60 }
 0xb0c   :  { %2854 = vmatmul.msk.f32.gmra.mxu0 %vm1096_vm14, %v4208_v37  ;;  %2872 = vmatmul.msk.f32.gmra.mxu2 %vm1096_vm14, %v64_v63 }
 0xb0d   :  { %v1822_v15 = vpop.f32.mrf.mxu3 }
 0xb0e   :  { %1878 = vst.msk [vmem:[%s4681_s9 + $0xa0] sm:$0xff] %vm110_vm1, %v1822_v15 }
 0xb14   :  { %2855 = vmatmul.msk.f32.gmra.mxu0 %vm1096_vm14, %v4215_v6  ;;  %2873 = vmatmul.msk.f32.gmra.mxu2 %vm1096_vm14, %v65_v3 }
 0xb15   :  { %v1825_v6 = vpop.f32.mrf.mxu3 }
 0xb16   :  { %1879 = vst.msk [vmem:[%s4681_s9 + $0xa8] sm:$0xff] %vm110_vm1, %v1825_v6 }
 0xb1c   :  { %2856 = vmatmul.msk.f32.gmra.mxu0 %vm1096_vm14, %v4222_v36  ;;  %2874 = vmatmul.msk.f32.gmra.mxu2 %vm1096_vm14, %v66_v8 }
 0xb24   :  { %2857 = vmatmul.msk.f32.gmra.mxu0 %vm1096_vm14, %v4229_v57  ;;  %2875 = vmatmul.msk.f32.gmra.mxu2 %vm1096_vm14, %v67_v61 }
 0xb2c   :  { %2858 = vmatmul.msk.f32.gmra.mxu0 %vm1096_vm14, %v4236_v51  ;;  %2876 = vmatmul.msk.f32.gmra.mxu2 %vm1096_vm14, %v68_v56  ;;  %v1828_v51 = vpop.f32.mrf.mxu3 }
 0xb2d   :  { %1880 = vst.msk [vmem:[%s4681_s9 + $0xb0] sm:$0xff] %vm110_vm1, %v1828_v51 }
 0xb34   :  { %2859 = vmatmul.msk.f32.gmra.mxu0 %vm1096_vm14, %v4243_v33  ;;  %2877 = vmatmul.msk.f32.gmra.mxu2 %vm1096_vm14, %v69_v4  ;;  %v1831_v12 = vpop.f32.mrf.mxu3 }
 0xb35   :  { %1881 = vst.msk [vmem:[%s4681_s9 + $0xb8] sm:$0xff] %vm110_vm1, %v1831_v12 }
 0xb3c   :  { %2860 = vmatmul.msk.f32.gmra.mxu0 %vm1096_vm14, %v4250_v59  ;;  %2878 = vmatmul.msk.f32.gmra.mxu2 %vm1096_vm14, %v70_v50 }
 0xb44   :  { %2861 = vmatmul.msk.f32.gmra.mxu0 %vm1096_vm14, %v4257_v16  ;;  %2879 = vmatmul.msk.f32.gmra.mxu2 %vm1096_vm14, %v71_v32 }
 0xb4c   :  { %2862 = vmatmul.msk.f32.gmra.mxu0 %vm1096_vm14, %v4264_v62  ;;  %2880 = vmatmul.msk.f32.gmra.mxu2 %vm1096_vm14, %v72_v34  ;;  %v1834_v62 = vpop.f32.mrf.mxu3 }
 0xb4d   :  { %1882 = vst.msk [vmem:[%s4681_s9 + $0xc0] sm:$0xff] %vm110_vm1, %v1834_v62 }
 0xb54   :  { %2863 = vmatmul.msk.f32.gmra.mxu0 %vm1096_vm14, %v4271_v28  ;;  %2881 = vmatmul.msk.f32.gmra.mxu2 %vm1096_vm14, %v73_v30  ;;  %v1837_v9 = vpop.f32.mrf.mxu3 }
 0xb55   :  { %1883 = vst.msk [vmem:[%s4681_s9 + $0xc8] sm:$0xff] %vm110_vm1, %v1837_v9 }
 0xb5c   :  { %2864 = vmatmul.msk.f32.gmra.mxu0 %vm1096_vm14, %v4278_v41  ;;  %2882 = vmatmul.msk.f32.gmra.mxu2 %vm1096_vm14, %v74_v17 }
 0xb64   :  { %2865 = vmatmul.msk.f32.gmra.mxu0 %vm1096_vm14, %v4285_v24  ;;  %v1840_v24 = vpop.f32.mrf.mxu3 }
 0xb65   :  { %1884 = vst.msk [vmem:[%s4681_s9 + $0xd0] sm:$0xff] %vm110_vm1, %v1840_v24 }
 0xb6c   :  { %2866 = vmatmul.msk.f32.gmra.mxu0 %vm1096_vm14, %v4292_v35  ;;  %v1843_v42 = vpop.f32.mrf.mxu3 }
 0xb6d   :  { %1885 = vst.msk [vmem:[%s4681_s9 + $0xd8] sm:$0xff] %vm110_vm1, %v1843_v42 }
 0xb71   :  { %v2466_v27 = vpop.f32.mrf.mxu0 }
 0xb72   :  { %2883 = vst.msk [vmem:[%s4681_s9 + $0x100] sm:$0xff] %vm110_vm1, %v2466_v27 }
 0xb74   :  { %2867 = vmatmul.msk.f32.gmra.mxu0 %vm1096_vm14, %v4299_v5  ;;  %v1846_v22 = vpop.f32.mrf.mxu3 }
 0xb75   :  { %1886 = vst.msk [vmem:[%s4681_s9 + $0xe0] sm:$0xff] %vm110_vm1, %v1846_v22 }
 0xb77   :  { %v2520_v29 = vpop.f32.mrf.mxu2 }
 0xb78   :  { %2901 = vst.msk [vmem:[%s4681_s9 + $0x190] sm:$0xff] %vm110_vm1, %v2520_v29 }
 0xb79   :  { %v2469_v1 = vpop.f32.mrf.mxu0 }
 0xb7a   :  { %2884 = vst.msk [vmem:[%s4681_s9 + $0x108] sm:$0xff] %vm110_vm1, %v2469_v1 }
 0xb7c   :  { %2868 = vmatmul.msk.f32.gmra.mxu0 %vm1096_vm14, %v4310_v52  ;;  %v1849_v13 = vpop.f32.mrf.mxu3 }
 0xb7d   :  { %1887 = vst.msk [vmem:[%s4681_s9 + $0xe8] sm:$0xff] %vm110_vm1, %v1849_v13 }
 0xb7f   :  { %v2523_v25 = vpop.f32.mrf.mxu2 }
 0xb80   :  { %2902 = vst.msk [vmem:[%s4681_s9 + $0x198] sm:$0xff] %vm110_vm1, %v2523_v25 }
 0xb81   :  { %v2472_v31 = vpop.f32.mrf.mxu0 }
 0xb82   :  { %2885 = vst.msk [vmem:[%s4681_s9 + $0x110] sm:$0xff] %vm110_vm1, %v2472_v31 }
 0xb84   :  { %v1852_v11 = vpop.f32.mrf.mxu3 }
 0xb85   :  { %1888 = vst.msk [vmem:[%s4681_s9 + $0xf0] sm:$0xff] %vm110_vm1, %v1852_v11 }
 0xb87   :  { %v2526_v40 = vpop.f32.mrf.mxu2 }
 0xb88   :  { %2903 = vst.msk [vmem:[%s4681_s9 + $0x1a0] sm:$0xff] %vm110_vm1, %v2526_v40 }
 0xb89   :  { %v2475_v37 = vpop.f32.mrf.mxu0 }
 0xb8a   :  { %2886 = vst.msk [vmem:[%s4681_s9 + $0x118] sm:$0xff] %vm110_vm1, %v2475_v37 }
 0xb8c   :  { %v1855_v63 = vpop.f32.mrf.mxu3 }
 0xb8d   :  { %1889 = vst.msk [vmem:[%s4681_s9 + $0xf8] sm:$0xff] %vm110_vm1, %v1855_v63 }
 0xb8f   :  { %v2529_v36 = vpop.f32.mrf.mxu2 }
 0xb90   :  { %2904 = vst.msk [vmem:[%s4681_s9 + $0x1a8] sm:$0xff] %vm110_vm1, %v2529_v36 }
 0xb91   :  { %v2478_v57 = vpop.f32.mrf.mxu0 }
 0xb92   :  { %2887 = vst.msk [vmem:[%s4681_s9 + $0x120] sm:$0xff] %vm110_vm1, %v2478_v57 }
 0xb97   :  { %v2532_v33 = vpop.f32.mrf.mxu2 }
 0xb98   :  { %2905 = vst.msk [vmem:[%s4681_s9 + $0x1b0] sm:$0xff] %vm110_vm1, %v2532_v33 }
 0xb99   :  { %v2481_v59 = vpop.f32.mrf.mxu0 }
 0xb9a   :  { %2888 = vst.msk [vmem:[%s4681_s9 + $0x128] sm:$0xff] %vm110_vm1, %v2481_v59 }
 0xb9f   :  { %v2535_v16 = vpop.f32.mrf.mxu2 }
 0xba0   :  { %2906 = vst.msk [vmem:[%s4681_s9 + $0x1b8] sm:$0xff] %vm110_vm1, %v2535_v16 }
 0xba1   :  { %v2484_v20 = vpop.f32.mrf.mxu0 }
 0xba2   :  { %2889 = vst.msk [vmem:[%s4681_s9 + $0x130] sm:$0xff] %vm110_vm1, %v2484_v20 }
 0xba7   :  { %v2538_v48 = vpop.f32.mrf.mxu2 }
 0xba8   :  { %2907 = vst.msk [vmem:[%s4681_s9 + $0x1c0] sm:$0xff] %vm110_vm1, %v2538_v48 }
 0xba9   :  { %v2487_v28 = vpop.f32.mrf.mxu0 }
 0xbaa   :  { %2890 = vst.msk [vmem:[%s4681_s9 + $0x138] sm:$0xff] %vm110_vm1, %v2487_v28 }
 0xbaf   :  { %v2541_v41 = vpop.f32.mrf.mxu2 }
 0xbb0   :  { %2908 = vst.msk [vmem:[%s4681_s9 + $0x1c8] sm:$0xff] %vm110_vm1, %v2541_v41 }
 0xbb1   :  { %v2490_v26 = vpop.f32.mrf.mxu0 }
 0xbb2   :  { %2891 = vst.msk [vmem:[%s4681_s9 + $0x140] sm:$0xff] %vm110_vm1, %v2490_v26 }
 0xbb7   :  { %v2544_v58 = vpop.f32.mrf.mxu2 }
 0xbb8   :  { %2909 = vst.msk [vmem:[%s4681_s9 + $0x1d0] sm:$0xff] %vm110_vm1, %v2544_v58 }
 0xbb9   :  { %v2493_v35 = vpop.f32.mrf.mxu0 }
 0xbba   :  { %2892 = vst.msk [vmem:[%s4681_s9 + $0x148] sm:$0xff] %vm110_vm1, %v2493_v35 }
 0xbbf   :  { %v2547_v5 = vpop.f32.mrf.mxu2 }
 0xbc0   :  { %2910 = vst.msk [vmem:[%s4681_s9 + $0x1d8] sm:$0xff] %vm110_vm1, %v2547_v5 }
 0xbc1   :  { %v2496_v23 = vpop.f32.mrf.mxu0 }
 0xbc2   :  { %2893 = vst.msk [vmem:[%s4681_s9 + $0x150] sm:$0xff] %vm110_vm1, %v2496_v23 }
 0xbc7   :  { %v2550_v52 = vpop.f32.mrf.mxu2 }
 0xbc8   :  { %2911 = vst.msk [vmem:[%s4681_s9 + $0x1e0] sm:$0xff] %vm110_vm1, %v2550_v52 }
 0xbc9   :  { %v2499_v39 = vpop.f32.mrf.mxu0 }
 0xbca   :  { %2894 = vst.msk [vmem:[%s4681_s9 + $0x158] sm:$0xff] %vm110_vm1, %v2499_v39 }
 0xbcf   :  { %v2553_v21 = vpop.f32.mrf.mxu2 }
 0xbd0   :  { %2912 = vst.msk [vmem:[%s4681_s9 + $0x1e8] sm:$0xff] %vm110_vm1, %v2553_v21 }
 0xbd1   :  { %v2502_v53 = vpop.f32.mrf.mxu0 }
 0xbd2   :  { %2895 = vst.msk [vmem:[%s4681_s9 + $0x160] sm:$0xff] %vm110_vm1, %v2502_v53 }
 0xbd7   :  { %v2556_v14 = vpop.f32.mrf.mxu2 }
 0xbd8   :  { %2913 = vst.msk [vmem:[%s4681_s9 + $0x1f0] sm:$0xff] %vm110_vm1, %v2556_v14 }
 0xbd9   :  { %v2505_v49 = vpop.f32.mrf.mxu0 }
 0xbda   :  { %2896 = vst.msk [vmem:[%s4681_s9 + $0x168] sm:$0xff] %vm110_vm1, %v2505_v49 }
 0xbdf   :  { %v2559_v7 = vpop.f32.mrf.mxu2 }
 0xbe0   :  { %2914 = vst.msk [vmem:[%s4681_s9 + $0x1f8] sm:$0xff] %vm110_vm1, %v2559_v7 }
 0xbe1   :  { %v2508_v3 = vpop.f32.mrf.mxu0 }
 0xbe2   :  { %2897 = vst.msk [vmem:[%s4681_s9 + $0x170] sm:$0xff] %vm110_vm1, %v2508_v3 }
 0xbe9   :  { %v2511_v47 = vpop.f32.mrf.mxu0 }
 0xbea   :  { %2898 = vst.msk [vmem:[%s4681_s9 + $0x178] sm:$0xff] %vm110_vm1, %v2511_v47 }
 0xbf1   :  { %v2514_v8 = vpop.f32.mrf.mxu0 }
 0xbf2   :  { %2899 = vst.msk [vmem:[%s4681_s9 + $0x180] sm:$0xff] %vm110_vm1, %v2514_v8 }
 0xbf9   :  { %v2517_v0 = vpop.f32.mrf.mxu0 }
 0xbfa   :  { %2900 = vst.msk [vmem:[%s4681_s9 + $0x188] sm:$0xff] %vm110_vm1, %v2517_v0 }

</bundles_post_ra>
